<compile_context>
chip_gen: v6e
topology: v6e:2x2x1
jax: 0.10.0
libtpu: 0.0.40
codegen_flags: <defaults>
</compile_context>

<pallas_src>
import functools

import jax
import jax.numpy as jnp
from jax.experimental import pallas as pl
from jax.experimental.pallas import tpu as pltpu


# --------------------------------------------------------------------------
# Encoder: single-layer LSTM over the source sequence, one pallas_call,
# recurrence as an in-kernel (unrolled) fori_loop.  Everything VMEM-resident.
# --------------------------------------------------------------------------
def encoder_kernel(emb_ref, wih_ref, whh_ref, b_ref,
                   enc_out_ref, hout_ref, cout_ref):
    S, B, _ = emb_ref.shape
    H = whh_ref.shape[0]

    def step(t, carry):
        h, c = carry                                        # [B, H] f32
        x_t = emb_ref[t]                                    # [B, E] bf16
        gates = (jnp.dot(x_t, wih_ref[...], preferred_element_type=jnp.float32)
                 + jnp.dot(h.astype(jnp.bfloat16), whh_ref[...],
                           preferred_element_type=jnp.float32)
                 + b_ref[...])                              # [B, 4H] f32
        # NOTE: with toy H the i/f/g/o lane slices are sub-vreg; in real configs keep H a
        # multiple of 128 (or use per-gate weights) so the slices are vreg-aligned views.
        i = jax.nn.sigmoid(gates[:, 0:H])
        f = jax.nn.sigmoid(gates[:, H:2 * H])
        g = jnp.tanh(gates[:, 2 * H:3 * H])
        o = jax.nn.sigmoid(gates[:, 3 * H:4 * H])
        c_new = f * c + i * g
        h_new = o * jnp.tanh(c_new)
        enc_out_ref[t] = h_new.astype(enc_out_ref.dtype)    # row t of resident output
        return h_new, c_new

    h0 = jnp.zeros((B, H), jnp.float32)
    c0 = jnp.zeros((B, H), jnp.float32)
    h, c = jax.lax.fori_loop(0, S, step, (h0, c0), unroll=True)
    hout_ref[...] = h
    cout_ref[...] = c


# --------------------------------------------------------------------------
# Fused decoder: grid=(tgt_len,).  Step 0 only initializes state (outputs[0]
# stays zero, matching the PyTorch reference); steps 1..T-1 run attention +
# LSTM cell + vocab projection + next-token selection.
# --------------------------------------------------------------------------
def fused_decoder_kernel(tf_ref,                      # SMEM [T] int32 teacher-force flags
                         tgt_ref,                     # [T, B, 1] int32 target tokens
                         h0_ref, c0_ref,              # [B, H] f32 initial state
                         enc_ref,                     # [B, S, H] bf16 encoder outputs
                         emb_ref,                     # [Vt, E] bf16 decoder embedding table
                         w_in_ref, b_in_ref,          # [E+2H, 4H] bf16, [1, 4H] f32
                         w_out_ref, b_out_ref,        # [2H, V] bf16, [1, V] f32
                         out_ref,                     # [T, B, V] f32 (resident)
                         h_sc, c_sc, x_sc):           # scratch: f32 [B,H] x2, bf16 [B,E]
    k = pl.program_id(0)
    B, H = h0_ref.shape
    V = w_out_ref.shape[1]
    Vt = emb_ref.shape[0]

    def embed(tok_b1):                                # [B,1] int32 -> [B,E] bf16 (one-hot matmul)
        onehot = (jax.lax.broadcasted_iota(jnp.int32, (B, Vt), 1)
                  == tok_b1).astype(jnp.bfloat16)     # [B, Vt]
        return jnp.dot(onehot, emb_ref[...],
                       preferred_element_type=jnp.float32).astype(jnp.bfloat16)

    @pl.when(k == 0)
    def _init():
        h_sc[...] = h0_ref[...]
        c_sc[...] = c0_ref[...]
        x_sc[...] = embed(tgt_ref[0])                 # x = target[0]
        out_ref[0] = jnp.zeros((B, V), jnp.float32)   # outputs[0] stays zero

    @pl.when(k > 0)
    def _step():
        h = h_sc[...]
        c = c_sc[...]
        h_b = h.astype(jnp.bfloat16)
        enc = enc_ref[...]                            # [B, S, H] bf16

        # --- dot-product attention over source positions (MXU batched einsums) ---
        q = h_b[:, None, :]                                                    # [B,1,H]
        scores = jnp.einsum('bqh,bsh->bqs', q, enc,
                            preferred_element_type=jnp.float32)                # [B,1,S]
        scores = scores - jnp.max(scores, axis=-1, keepdims=True)
        p = jnp.exp(scores)
        attn = p / jnp.sum(p, axis=-1, keepdims=True)                          # [B,1,S]
        context = jnp.einsum('bqs,bsh->bqh', attn.astype(jnp.bfloat16), enc,
                             preferred_element_type=jnp.float32)[:, 0, :]      # [B,H] f32
        ctx_b = context.astype(jnp.bfloat16)

        # --- LSTM cell: single fused matmul on concat(embedded, context, h) ---
        xin = jnp.concatenate([x_sc[...], ctx_b, h_b], axis=-1)                # [B, E+2H]
        gates = (jnp.dot(xin, w_in_ref[...], preferred_element_type=jnp.float32)
                 + b_in_ref[...])                                              # [B, 4H]
        i = jax.nn.sigmoid(gates[:, 0:H])
        f = jax.nn.sigmoid(gates[:, H:2 * H])
        g = jnp.tanh(gates[:, 2 * H:3 * H])
        o = jax.nn.sigmoid(gates[:, 3 * H:4 * H])
        c_new = f * c + i * g
        h_new = o * jnp.tanh(c_new)

        # --- output projection: single fused matmul on concat(h_new, context) ---
        pout = jnp.concatenate([h_new.astype(jnp.bfloat16), ctx_b], axis=-1)   # [B, 2H]
        logits = (jnp.dot(pout, w_out_ref[...], preferred_element_type=jnp.float32)
                  + b_out_ref[...])                                            # [B, V]

        out_ref[k] = logits
        h_sc[...] = h_new
        c_sc[...] = c_new

        # --- next input token: teacher forcing vs argmax (skipped on last step) ---
        @pl.when(k < pl.num_programs(0) - 1)
        def _next():
            col = jax.lax.broadcasted_iota(jnp.int32, (B, V), 1)
            mx = jnp.max(logits, axis=-1, keepdims=True)
            best = jnp.min(jnp.where(logits >= mx, col, V),
                           axis=-1, keepdims=True)                             # [B,1] argmax
            tok = jnp.where(tf_ref[k] > 0, tgt_ref[k], best)                   # [B,1]
            x_sc[...] = embed(tok)


# --------------------------------------------------------------------------
# Whole forward (one jit -> one XLA executable containing the two pallas_calls)
# --------------------------------------------------------------------------
@functools.partial(jax.jit, static_argnames=("teacher_force_ratio",))
def _forward(params, source, target, rng_key, teacher_force_ratio):
    # ---- encoder ----
    emb = params["enc_embedding"][source].astype(jnp.bfloat16)    # [S, B, E] gather = glue
    S, B, E = emb.shape
    H = params["enc_whh"].shape[0]
    enc_out, h, c = pl.pallas_call(
        encoder_kernel,
        out_shape=(jax.ShapeDtypeStruct((S, B, H), jnp.bfloat16),
                   jax.ShapeDtypeStruct((B, H), jnp.float32),
                   jax.ShapeDtypeStruct((B, H), jnp.float32)),
    )(emb,
      params["enc_wih"].astype(jnp.bfloat16),
      params["enc_whh"].astype(jnp.bfloat16),
      params["enc_b"])

    # ---- decoder setup (plain-JAX glue, fused into the same executable) ----
    T = target.shape[0]
    V = params["dec_wfc_h"].shape[1]
    Vt, E_dec = params["dec_embedding"].shape
    enc_bsh = jnp.transpose(enc_out, (1, 0, 2))                   # [B, S, H] bf16
    w_in = jnp.concatenate([params["dec_wie"], params["dec_wic"], params["dec_whh"]],
                           axis=0).astype(jnp.bfloat16)           # [E+2H, 4H]
    w_out = jnp.concatenate([params["dec_wfc_h"], params["dec_wfc_c"]],
                            axis=0).astype(jnp.bfloat16)          # [2H, V]
    emb_tab = params["dec_embedding"].astype(jnp.bfloat16)        # [Vt, E]
    tgt_tok = target.astype(jnp.int32)[:, :, None]                # [T, B, 1]
    # TODO(synk): torch.rand(1).item() host coin flips -> precomputed jax.random draws.
    tf_flags = (jax.random.uniform(rng_key, (T,)) < teacher_force_ratio).astype(jnp.int32)

    cexpr = lambda *shape: None  # noqa: E731  (placeholder to keep lambdas short below)

    outputs = pl.pallas_call(
        fused_decoder_kernel,
        out_shape=jax.ShapeDtypeStruct((T, B, V), jnp.float32),
        grid_spec=pltpu.PrefetchScalarGridSpec(
            num_scalar_prefetch=1,                    # tf_flags -> SMEM
            grid=(T,),
            in_specs=[
                pl.BlockSpec((T, B, 1), lambda k, tf: (0, 0, 0)),          # target tokens
                pl.BlockSpec((B, H), lambda k, tf: (0, 0)),                # h0
                pl.BlockSpec((B, H), lambda k, tf: (0, 0)),                # c0
                pl.BlockSpec((B, S, H), lambda k, tf: (0, 0, 0)),          # encoder outputs
                pl.BlockSpec((Vt, E_dec), lambda k, tf: (0, 0)),           # dec embedding
                pl.BlockSpec((E_dec + 2 * H, 4 * H), lambda k, tf: (0, 0)),# fused W_in
                pl.BlockSpec((1, 4 * H), lambda k, tf: (0, 0)),            # b_in
                pl.BlockSpec((2 * H, V), lambda k, tf: (0, 0)),            # fused W_out
                pl.BlockSpec((1, V), lambda k, tf: (0, 0)),                # b_out
            ],
            # resident output block: one HBM writeback for the whole [T,B,V] tensor
            out_specs=pl.BlockSpec((T, B, V), lambda k, tf: (0, 0, 0)),
            scratch_shapes=[pltpu.VMEM((B, H), jnp.float32),     # h
                            pltpu.VMEM((B, H), jnp.float32),     # c
                            pltpu.VMEM((B, E_dec), jnp.bfloat16)]),  # current x embedding
        compiler_params=pltpu.CompilerParams(
            dimension_semantics=("arbitrary",)),      # sequential recurrence over time
    )(tf_flags, tgt_tok, h, c, enc_bsh, emb_tab,
      w_in, params["dec_b"], w_out, params["dec_bfc"])
    return outputs


def seq2seq_lstm_forward(params, source, target, teacher_force_ratio=0.5, rng_key=None):
    """source: [src_len, batch] int32, target: [tgt_len, batch] int32."""
    if rng_key is None:
        rng_key = jax.random.PRNGKey(1)
    return _forward(params, source, target, rng_key, float(teacher_force_ratio))


# --------------------------------------------------------------------------
# Deterministic parameter init (stored f32; cast to bf16 at the matmul inputs)
# --------------------------------------------------------------------------
def init_params(key, src_vocab, tgt_vocab, emb_dim, hidden):
    ks = jax.random.split(key, 12)
    n = lambda k, s: (0.1 * jax.random.normal(k, s)).astype(jnp.float32)
    return {
        # encoder
        "enc_embedding": n(ks[0], (src_vocab, emb_dim)),
        "enc_wih": n(ks[1], (emb_dim, 4 * hidden)),
        "enc_whh": n(ks[2], (hidden, 4 * hidden)),
        "enc_b":   n(ks[3], (1, 4 * hidden)),
        # decoder
        "dec_embedding": n(ks[4], (tgt_vocab, emb_dim)),
        "dec_wie": n(ks[5], (emb_dim, 4 * hidden)),
        "dec_wic": n(ks[6], (hidden, 4 * hidden)),
        "dec_whh": n(ks[7], (hidden, 4 * hidden)),
        "dec_b":   n(ks[8], (1, 4 * hidden)),
        "dec_wfc_h": n(ks[9], (hidden, tgt_vocab)),
        "dec_wfc_c": n(ks[10], (hidden, tgt_vocab)),
        "dec_bfc":   n(ks[11], (1, tgt_vocab)),
    }


if __name__ == "__main__":
    SRC_VOCAB, TGT_VOCAB = 20, 16
    EMB, HIDDEN = 16, 32
    SRC_LEN, TGT_LEN, BATCH = 8, 8, 8

    key = jax.random.PRNGKey(0)
    kp, ks, kt = jax.random.split(key, 3)
    params = init_params(kp, SRC_VOCAB, TGT_VOCAB, EMB, HIDDEN)

    source = jax.random.randint(ks, (SRC_LEN, BATCH), 0, SRC_VOCAB, dtype=jnp.int32)
    target = jax.random.randint(kt, (TGT_LEN, BATCH), 0, TGT_VOCAB, dtype=jnp.int32)

    outputs = seq2seq_lstm_forward(params, source, target,
                                   teacher_force_ratio=0.5,
                                   rng_key=jax.random.PRNGKey(1))
    outputs = jax.block_until_ready(outputs)

    assert outputs.shape == (TGT_LEN, BATCH, TGT_VOCAB)
    assert bool(jnp.all(jnp.isfinite(outputs)))
    assert bool(jnp.all(outputs[0] == 0.0))   # outputs[0] stays zero per reference
    print("KERNEL_OK")
</pallas_src>

<mosaic_0001>
module attributes {stable_mosaic.version = 11 : i64} {
  func.func @encoder_kernel(%arg0: memref<8x8x16xbf16, #tpu.memory_space<vmem>>, %arg1: memref<16x128xbf16, #tpu.memory_space<vmem>>, %arg2: memref<32x128xbf16, #tpu.memory_space<vmem>>, %arg3: memref<1x128xf32, #tpu.memory_space<vmem>>, %arg4: memref<8x8x32xbf16, #tpu.memory_space<vmem>>, %arg5: memref<8x32xf32, #tpu.memory_space<vmem>>, %arg6: memref<8x32xf32, #tpu.memory_space<vmem>>) attributes {dimension_semantics = [], scalar_prefetch = 0 : i64, scratch_operands = 0 : i64, tpu.core_type = #tpu.core_type<tc>} {
    %cst = arith.constant 0.000000e+00 : f32
    %0 = vector.broadcast %cst : f32 to vector<8x32xf32>
    %cst_0 = arith.constant 0.000000e+00 : f32
    %1 = vector.broadcast %cst_0 : f32 to vector<8x32xf32>
    %c0_i32 = arith.constant 0 : i32
    %2 = arith.index_cast %c0_i32 : i32 to index
    %c0 = arith.constant 0 : index
    %c0_1 = arith.constant 0 : index
    %3 = vector.load %arg0[%2, %c0, %c0_1] : memref<8x8x16xbf16, #tpu.memory_space<vmem>>, vector<1x8x16xbf16>
    %4 = vector.shape_cast %3 : vector<1x8x16xbf16> to vector<8x16xbf16>
    %c0_2 = arith.constant 0 : index
    %c0_3 = arith.constant 0 : index
    %5 = vector.load %arg1[%c0_2, %c0_3] : memref<16x128xbf16, #tpu.memory_space<vmem>>, vector<16x128xbf16>
    %cst_4 = arith.constant dense<0.000000e+00> : vector<8x128xf32>
    %6 = tpu.matmul %4, %5, %cst_4 {dimension_numbers = #tpu.dot_dimension_numbers<[1], [0], [0], [1], [0, 0, 1, 1], [], []>} : vector<8x16xbf16>, vector<16x128xbf16>, vector<8x128xf32> -> vector<8x128xf32>
    %7 = arith.truncf %0 : vector<8x32xf32> to vector<8x32xbf16>
    %c0_5 = arith.constant 0 : index
    %c0_6 = arith.constant 0 : index
    %8 = vector.load %arg2[%c0_5, %c0_6] : memref<32x128xbf16, #tpu.memory_space<vmem>>, vector<32x128xbf16>
    %cst_7 = arith.constant dense<0.000000e+00> : vector<8x128xf32>
    %9 = tpu.matmul %7, %8, %cst_7 {dimension_numbers = #tpu.dot_dimension_numbers<[1], [0], [0], [1], [0, 0, 1, 1], [], []>} : vector<8x32xbf16>, vector<32x128xbf16>, vector<8x128xf32> -> vector<8x128xf32>
    %10 = arith.addf %6, %9 : vector<8x128xf32>
    %c0_8 = arith.constant 0 : index
    %c0_9 = arith.constant 0 : index
    %11 = vector.load %arg3[%c0_8, %c0_9] : memref<1x128xf32, #tpu.memory_space<vmem>>, vector<1x128xf32>
    %12 = vector.broadcast %11 : vector<1x128xf32> to vector<8x128xf32>
    %13 = arith.addf %10, %12 : vector<8x128xf32>
    %14 = vector.extract_strided_slice %13 {offsets = [0, 0], sizes = [8, 32], strides = [1, 1]} : vector<8x128xf32> to vector<8x32xf32>
    %15 = arith.negf %14 : vector<8x32xf32>
    %16 = math.exp %15 : vector<8x32xf32>
    %cst_10 = arith.constant 1.000000e+00 : f32
    %17 = vector.broadcast %cst_10 : f32 to vector<8x32xf32>
    %18 = arith.addf %17, %16 : vector<8x32xf32>
    %19 = arith.divf %17, %18 : vector<8x32xf32>
    %20 = vector.extract_strided_slice %13 {offsets = [0, 32], sizes = [8, 32], strides = [1, 1]} : vector<8x128xf32> to vector<8x32xf32>
    %21 = arith.negf %20 : vector<8x32xf32>
    %22 = math.exp %21 : vector<8x32xf32>
    %cst_11 = arith.constant 1.000000e+00 : f32
    %23 = vector.broadcast %cst_11 : f32 to vector<8x32xf32>
    %24 = arith.addf %23, %22 : vector<8x32xf32>
    %25 = arith.divf %23, %24 : vector<8x32xf32>
    %26 = vector.extract_strided_slice %13 {offsets = [0, 64], sizes = [8, 32], strides = [1, 1]} : vector<8x128xf32> to vector<8x32xf32>
    %27 = math.tanh %26 : vector<8x32xf32>
    %28 = vector.extract_strided_slice %13 {offsets = [0, 96], sizes = [8, 32], strides = [1, 1]} : vector<8x128xf32> to vector<8x32xf32>
    %29 = arith.negf %28 : vector<8x32xf32>
    %30 = math.exp %29 : vector<8x32xf32>
    %cst_12 = arith.constant 1.000000e+00 : f32
    %31 = vector.broadcast %cst_12 : f32 to vector<8x32xf32>
    %32 = arith.addf %31, %30 : vector<8x32xf32>
    %33 = arith.divf %31, %32 : vector<8x32xf32>
    %34 = arith.mulf %25, %1 : vector<8x32xf32>
    %35 = arith.mulf %19, %27 : vector<8x32xf32>
    %36 = arith.addf %34, %35 : vector<8x32xf32>
    %37 = math.tanh %36 : vector<8x32xf32>
    %38 = arith.mulf %33, %37 : vector<8x32xf32>
    %39 = arith.truncf %38 : vector<8x32xf32> to vector<8x32xbf16>
    %40 = arith.index_cast %c0_i32 : i32 to index
    %c0_13 = arith.constant 0 : index
    %c0_14 = arith.constant 0 : index
    %41 = vector.load %arg4[%40, %c0_13, %c0_14] : memref<8x8x32xbf16, #tpu.memory_space<vmem>>, vector<1x8x32xbf16>
    %42 = vector.shape_cast %41 : vector<1x8x32xbf16> to vector<8x32xbf16>
    %43 = vector.shape_cast %39 : vector<8x32xbf16> to vector<1x8x32xbf16>
    tpu.vector_store %arg4[%40, %c0_13, %c0_14], %43 {strides = array<i32>} : memref<8x8x32xbf16, #tpu.memory_space<vmem>>, vector<1x8x32xbf16>,
    %c1_i32 = arith.constant 1 : i32
    %44 = arith.index_cast %c1_i32 : i32 to index
    %c0_15 = arith.constant 0 : index
    %c0_16 = arith.constant 0 : index
    %45 = vector.load %arg0[%44, %c0_15, %c0_16] : memref<8x8x16xbf16, #tpu.memory_space<vmem>>, vector<1x8x16xbf16>
    %46 = vector.shape_cast %45 : vector<1x8x16xbf16> to vector<8x16xbf16>
    %c0_17 = arith.constant 0 : index
    %c0_18 = arith.constant 0 : index
    %47 = vector.load %arg1[%c0_17, %c0_18] : memref<16x128xbf16, #tpu.memory_space<vmem>>, vector<16x128xbf16>
    %cst_19 = arith.constant dense<0.000000e+00> : vector<8x128xf32>
    %48 = tpu.matmul %46, %47, %cst_19 {dimension_numbers = #tpu.dot_dimension_numbers<[1], [0], [0], [1], [0, 0, 1, 1], [], []>} : vector<8x16xbf16>, vector<16x128xbf16>, vector<8x128xf32> -> vector<8x128xf32>
    %49 = arith.truncf %38 : vector<8x32xf32> to vector<8x32xbf16>
    %c0_20 = arith.constant 0 : index
    %c0_21 = arith.constant 0 : index
    %50 = vector.load %arg2[%c0_20, %c0_21] : memref<32x128xbf16, #tpu.memory_space<vmem>>, vector<32x128xbf16>
    %cst_22 = arith.constant dense<0.000000e+00> : vector<8x128xf32>
    %51 = tpu.matmul %49, %50, %cst_22 {dimension_numbers = #tpu.dot_dimension_numbers<[1], [0], [0], [1], [0, 0, 1, 1], [], []>} : vector<8x32xbf16>, vector<32x128xbf16>, vector<8x128xf32> -> vector<8x128xf32>
    %52 = arith.addf %48, %51 : vector<8x128xf32>
    %c0_23 = arith.constant 0 : index
    %c0_24 = arith.constant 0 : index
    %53 = vector.load %arg3[%c0_23, %c0_24] : memref<1x128xf32, #tpu.memory_space<vmem>>, vector<1x128xf32>
    %54 = vector.broadcast %53 : vector<1x128xf32> to vector<8x128xf32>
    %55 = arith.addf %52, %54 : vector<8x128xf32>
    %56 = vector.extract_strided_slice %55 {offsets = [0, 0], sizes = [8, 32], strides = [1, 1]} : vector<8x128xf32> to vector<8x32xf32>
    %57 = arith.negf %56 : vector<8x32xf32>
    %58 = math.exp %57 : vector<8x32xf32>
    %cst_25 = arith.constant 1.000000e+00 : f32
    %59 = vector.broadcast %cst_25 : f32 to vector<8x32xf32>
    %60 = arith.addf %59, %58 : vector<8x32xf32>
    %61 = arith.divf %59, %60 : vector<8x32xf32>
    %62 = vector.extract_strided_slice %55 {offsets = [0, 32], sizes = [8, 32], strides = [1, 1]} : vector<8x128xf32> to vector<8x32xf32>
    %63 = arith.negf %62 : vector<8x32xf32>
    %64 = math.exp %63 : vector<8x32xf32>
    %cst_26 = arith.constant 1.000000e+00 : f32
    %65 = vector.broadcast %cst_26 : f32 to vector<8x32xf32>
    %66 = arith.addf %65, %64 : vector<8x32xf32>
    %67 = arith.divf %65, %66 : vector<8x32xf32>
    %68 = vector.extract_strided_slice %55 {offsets = [0, 64], sizes = [8, 32], strides = [1, 1]} : vector<8x128xf32> to vector<8x32xf32>
    %69 = math.tanh %68 : vector<8x32xf32>
    %70 = vector.extract_strided_slice %55 {offsets = [0, 96], sizes = [8, 32], strides = [1, 1]} : vector<8x128xf32> to vector<8x32xf32>
    %71 = arith.negf %70 : vector<8x32xf32>
    %72 = math.exp %71 : vector<8x32xf32>
    %cst_27 = arith.constant 1.000000e+00 : f32
    %73 = vector.broadcast %cst_27 : f32 to vector<8x32xf32>
    %74 = arith.addf %73, %72 : vector<8x32xf32>
    %75 = arith.divf %73, %74 : vector<8x32xf32>
    %76 = arith.mulf %67, %36 : vector<8x32xf32>
    %77 = arith.mulf %61, %69 : vector<8x32xf32>
    %78 = arith.addf %76, %77 : vector<8x32xf32>
    %79 = math.tanh %78 : vector<8x32xf32>
    %80 = arith.mulf %75, %79 : vector<8x32xf32>
    %81 = arith.truncf %80 : vector<8x32xf32> to vector<8x32xbf16>
    %82 = arith.index_cast %c1_i32 : i32 to index
    %c0_28 = arith.constant 0 : index
    %c0_29 = arith.constant 0 : index
    %83 = vector.load %arg4[%82, %c0_28, %c0_29] : memref<8x8x32xbf16, #tpu.memory_space<vmem>>, vector<1x8x32xbf16>
    %84 = vector.shape_cast %83 : vector<1x8x32xbf16> to vector<8x32xbf16>
    %85 = vector.shape_cast %81 : vector<8x32xbf16> to vector<1x8x32xbf16>
    tpu.vector_store %arg4[%82, %c0_28, %c0_29], %85 {strides = array<i32>} : memref<8x8x32xbf16, #tpu.memory_space<vmem>>, vector<1x8x32xbf16>,
    %c2_i32 = arith.constant 2 : i32
    %86 = arith.index_cast %c2_i32 : i32 to index
    %c0_30 = arith.constant 0 : index
    %c0_31 = arith.constant 0 : index
    %87 = vector.load %arg0[%86, %c0_30, %c0_31] : memref<8x8x16xbf16, #tpu.memory_space<vmem>>, vector<1x8x16xbf16>
    %88 = vector.shape_cast %87 : vector<1x8x16xbf16> to vector<8x16xbf16>
    %c0_32 = arith.constant 0 : index
    %c0_33 = arith.constant 0 : index
    %89 = vector.load %arg1[%c0_32, %c0_33] : memref<16x128xbf16, #tpu.memory_space<vmem>>, vector<16x128xbf16>
    %cst_34 = arith.constant dense<0.000000e+00> : vector<8x128xf32>
    %90 = tpu.matmul %88, %89, %cst_34 {dimension_numbers = #tpu.dot_dimension_numbers<[1], [0], [0], [1], [0, 0, 1, 1], [], []>} : vector<8x16xbf16>, vector<16x128xbf16>, vector<8x128xf32> -> vector<8x128xf32>
    %91 = arith.truncf %80 : vector<8x32xf32> to vector<8x32xbf16>
    %c0_35 = arith.constant 0 : index
    %c0_36 = arith.constant 0 : index
    %92 = vector.load %arg2[%c0_35, %c0_36] : memref<32x128xbf16, #tpu.memory_space<vmem>>, vector<32x128xbf16>
    %cst_37 = arith.constant dense<0.000000e+00> : vector<8x128xf32>
    %93 = tpu.matmul %91, %92, %cst_37 {dimension_numbers = #tpu.dot_dimension_numbers<[1], [0], [0], [1], [0, 0, 1, 1], [], []>} : vector<8x32xbf16>, vector<32x128xbf16>, vector<8x128xf32> -> vector<8x128xf32>
    %94 = arith.addf %90, %93 : vector<8x128xf32>
    %c0_38 = arith.constant 0 : index
    %c0_39 = arith.constant 0 : index
    %95 = vector.load %arg3[%c0_38, %c0_39] : memref<1x128xf32, #tpu.memory_space<vmem>>, vector<1x128xf32>
    %96 = vector.broadcast %95 : vector<1x128xf32> to vector<8x128xf32>
    %97 = arith.addf %94, %96 : vector<8x128xf32>
    %98 = vector.extract_strided_slice %97 {offsets = [0, 0], sizes = [8, 32], strides = [1, 1]} : vector<8x128xf32> to vector<8x32xf32>
    %99 = arith.negf %98 : vector<8x32xf32>
    %100 = math.exp %99 : vector<8x32xf32>
    %cst_40 = arith.constant 1.000000e+00 : f32
    %101 = vector.broadcast %cst_40 : f32 to vector<8x32xf32>
    %102 = arith.addf %101, %100 : vector<8x32xf32>
    %103 = arith.divf %101, %102 : vector<8x32xf32>
    %104 = vector.extract_strided_slice %97 {offsets = [0, 32], sizes = [8, 32], strides = [1, 1]} : vector<8x128xf32> to vector<8x32xf32>
    %105 = arith.negf %104 : vector<8x32xf32>
    %106 = math.exp %105 : vector<8x32xf32>
    %cst_41 = arith.constant 1.000000e+00 : f32
    %107 = vector.broadcast %cst_41 : f32 to vector<8x32xf32>
    %108 = arith.addf %107, %106 : vector<8x32xf32>
    %109 = arith.divf %107, %108 : vector<8x32xf32>
    %110 = vector.extract_strided_slice %97 {offsets = [0, 64], sizes = [8, 32], strides = [1, 1]} : vector<8x128xf32> to vector<8x32xf32>
    %111 = math.tanh %110 : vector<8x32xf32>
    %112 = vector.extract_strided_slice %97 {offsets = [0, 96], sizes = [8, 32], strides = [1, 1]} : vector<8x128xf32> to vector<8x32xf32>
    %113 = arith.negf %112 : vector<8x32xf32>
    %114 = math.exp %113 : vector<8x32xf32>
    %cst_42 = arith.constant 1.000000e+00 : f32
    %115 = vector.broadcast %cst_42 : f32 to vector<8x32xf32>
    %116 = arith.addf %115, %114 : vector<8x32xf32>
    %117 = arith.divf %115, %116 : vector<8x32xf32>
    %118 = arith.mulf %109, %78 : vector<8x32xf32>
    %119 = arith.mulf %103, %111 : vector<8x32xf32>
    %120 = arith.addf %118, %119 : vector<8x32xf32>
    %121 = math.tanh %120 : vector<8x32xf32>
    %122 = arith.mulf %117, %121 : vector<8x32xf32>
    %123 = arith.truncf %122 : vector<8x32xf32> to vector<8x32xbf16>
    %124 = arith.index_cast %c2_i32 : i32 to index
    %c0_43 = arith.constant 0 : index
    %c0_44 = arith.constant 0 : index
    %125 = vector.load %arg4[%124, %c0_43, %c0_44] : memref<8x8x32xbf16, #tpu.memory_space<vmem>>, vector<1x8x32xbf16>
    %126 = vector.shape_cast %125 : vector<1x8x32xbf16> to vector<8x32xbf16>
    %127 = vector.shape_cast %123 : vector<8x32xbf16> to vector<1x8x32xbf16>
    tpu.vector_store %arg4[%124, %c0_43, %c0_44], %127 {strides = array<i32>} : memref<8x8x32xbf16, #tpu.memory_space<vmem>>, vector<1x8x32xbf16>,
    %c3_i32 = arith.constant 3 : i32
    %128 = arith.index_cast %c3_i32 : i32 to index
    %c0_45 = arith.constant 0 : index
    %c0_46 = arith.constant 0 : index
    %129 = vector.load %arg0[%128, %c0_45, %c0_46] : memref<8x8x16xbf16, #tpu.memory_space<vmem>>, vector<1x8x16xbf16>
    %130 = vector.shape_cast %129 : vector<1x8x16xbf16> to vector<8x16xbf16>
    %c0_47 = arith.constant 0 : index
    %c0_48 = arith.constant 0 : index
    %131 = vector.load %arg1[%c0_47, %c0_48] : memref<16x128xbf16, #tpu.memory_space<vmem>>, vector<16x128xbf16>
    %cst_49 = arith.constant dense<0.000000e+00> : vector<8x128xf32>
    %132 = tpu.matmul %130, %131, %cst_49 {dimension_numbers = #tpu.dot_dimension_numbers<[1], [0], [0], [1], [0, 0, 1, 1], [], []>} : vector<8x16xbf16>, vector<16x128xbf16>, vector<8x128xf32> -> vector<8x128xf32>
    %133 = arith.truncf %122 : vector<8x32xf32> to vector<8x32xbf16>
    %c0_50 = arith.constant 0 : index
    %c0_51 = arith.constant 0 : index
    %134 = vector.load %arg2[%c0_50, %c0_51] : memref<32x128xbf16, #tpu.memory_space<vmem>>, vector<32x128xbf16>
    %cst_52 = arith.constant dense<0.000000e+00> : vector<8x128xf32>
    %135 = tpu.matmul %133, %134, %cst_52 {dimension_numbers = #tpu.dot_dimension_numbers<[1], [0], [0], [1], [0, 0, 1, 1], [], []>} : vector<8x32xbf16>, vector<32x128xbf16>, vector<8x128xf32> -> vector<8x128xf32>
    %136 = arith.addf %132, %135 : vector<8x128xf32>
    %c0_53 = arith.constant 0 : index
    %c0_54 = arith.constant 0 : index
    %137 = vector.load %arg3[%c0_53, %c0_54] : memref<1x128xf32, #tpu.memory_space<vmem>>, vector<1x128xf32>
    %138 = vector.broadcast %137 : vector<1x128xf32> to vector<8x128xf32>
    %139 = arith.addf %136, %138 : vector<8x128xf32>
    %140 = vector.extract_strided_slice %139 {offsets = [0, 0], sizes = [8, 32], strides = [1, 1]} : vector<8x128xf32> to vector<8x32xf32>
    %141 = arith.negf %140 : vector<8x32xf32>
    %142 = math.exp %141 : vector<8x32xf32>
    %cst_55 = arith.constant 1.000000e+00 : f32
    %143 = vector.broadcast %cst_55 : f32 to vector<8x32xf32>
    %144 = arith.addf %143, %142 : vector<8x32xf32>
    %145 = arith.divf %143, %144 : vector<8x32xf32>
    %146 = vector.extract_strided_slice %139 {offsets = [0, 32], sizes = [8, 32], strides = [1, 1]} : vector<8x128xf32> to vector<8x32xf32>
    %147 = arith.negf %146 : vector<8x32xf32>
    %148 = math.exp %147 : vector<8x32xf32>
    %cst_56 = arith.constant 1.000000e+00 : f32
    %149 = vector.broadcast %cst_56 : f32 to vector<8x32xf32>
    %150 = arith.addf %149, %148 : vector<8x32xf32>
    %151 = arith.divf %149, %150 : vector<8x32xf32>
    %152 = vector.extract_strided_slice %139 {offsets = [0, 64], sizes = [8, 32], strides = [1, 1]} : vector<8x128xf32> to vector<8x32xf32>
    %153 = math.tanh %152 : vector<8x32xf32>
    %154 = vector.extract_strided_slice %139 {offsets = [0, 96], sizes = [8, 32], strides = [1, 1]} : vector<8x128xf32> to vector<8x32xf32>
    %155 = arith.negf %154 : vector<8x32xf32>
    %156 = math.exp %155 : vector<8x32xf32>
    %cst_57 = arith.constant 1.000000e+00 : f32
    %157 = vector.broadcast %cst_57 : f32 to vector<8x32xf32>
    %158 = arith.addf %157, %156 : vector<8x32xf32>
    %159 = arith.divf %157, %158 : vector<8x32xf32>
    %160 = arith.mulf %151, %120 : vector<8x32xf32>
    %161 = arith.mulf %145, %153 : vector<8x32xf32>
    %162 = arith.addf %160, %161 : vector<8x32xf32>
    %163 = math.tanh %162 : vector<8x32xf32>
    %164 = arith.mulf %159, %163 : vector<8x32xf32>
    %165 = arith.truncf %164 : vector<8x32xf32> to vector<8x32xbf16>
    %166 = arith.index_cast %c3_i32 : i32 to index
    %c0_58 = arith.constant 0 : index
    %c0_59 = arith.constant 0 : index
    %167 = vector.load %arg4[%166, %c0_58, %c0_59] : memref<8x8x32xbf16, #tpu.memory_space<vmem>>, vector<1x8x32xbf16>
    %168 = vector.shape_cast %167 : vector<1x8x32xbf16> to vector<8x32xbf16>
    %169 = vector.shape_cast %165 : vector<8x32xbf16> to vector<1x8x32xbf16>
    tpu.vector_store %arg4[%166, %c0_58, %c0_59], %169 {strides = array<i32>} : memref<8x8x32xbf16, #tpu.memory_space<vmem>>, vector<1x8x32xbf16>,
    %c4_i32 = arith.constant 4 : i32
    %170 = arith.index_cast %c4_i32 : i32 to index
    %c0_60 = arith.constant 0 : index
    %c0_61 = arith.constant 0 : index
    %171 = vector.load %arg0[%170, %c0_60, %c0_61] : memref<8x8x16xbf16, #tpu.memory_space<vmem>>, vector<1x8x16xbf16>
    %172 = vector.shape_cast %171 : vector<1x8x16xbf16> to vector<8x16xbf16>
    %c0_62 = arith.constant 0 : index
    %c0_63 = arith.constant 0 : index
    %173 = vector.load %arg1[%c0_62, %c0_63] : memref<16x128xbf16, #tpu.memory_space<vmem>>, vector<16x128xbf16>
    %cst_64 = arith.constant dense<0.000000e+00> : vector<8x128xf32>
    %174 = tpu.matmul %172, %173, %cst_64 {dimension_numbers = #tpu.dot_dimension_numbers<[1], [0], [0], [1], [0, 0, 1, 1], [], []>} : vector<8x16xbf16>, vector<16x128xbf16>, vector<8x128xf32> -> vector<8x128xf32>
    %175 = arith.truncf %164 : vector<8x32xf32> to vector<8x32xbf16>
    %c0_65 = arith.constant 0 : index
    %c0_66 = arith.constant 0 : index
    %176 = vector.load %arg2[%c0_65, %c0_66] : memref<32x128xbf16, #tpu.memory_space<vmem>>, vector<32x128xbf16>
    %cst_67 = arith.constant dense<0.000000e+00> : vector<8x128xf32>
    %177 = tpu.matmul %175, %176, %cst_67 {dimension_numbers = #tpu.dot_dimension_numbers<[1], [0], [0], [1], [0, 0, 1, 1], [], []>} : vector<8x32xbf16>, vector<32x128xbf16>, vector<8x128xf32> -> vector<8x128xf32>
    %178 = arith.addf %174, %177 : vector<8x128xf32>
    %c0_68 = arith.constant 0 : index
    %c0_69 = arith.constant 0 : index
    %179 = vector.load %arg3[%c0_68, %c0_69] : memref<1x128xf32, #tpu.memory_space<vmem>>, vector<1x128xf32>
    %180 = vector.broadcast %179 : vector<1x128xf32> to vector<8x128xf32>
    %181 = arith.addf %178, %180 : vector<8x128xf32>
    %182 = vector.extract_strided_slice %181 {offsets = [0, 0], sizes = [8, 32], strides = [1, 1]} : vector<8x128xf32> to vector<8x32xf32>
    %183 = arith.negf %182 : vector<8x32xf32>
    %184 = math.exp %183 : vector<8x32xf32>
    %cst_70 = arith.constant 1.000000e+00 : f32
    %185 = vector.broadcast %cst_70 : f32 to vector<8x32xf32>
    %186 = arith.addf %185, %184 : vector<8x32xf32>
    %187 = arith.divf %185, %186 : vector<8x32xf32>
    %188 = vector.extract_strided_slice %181 {offsets = [0, 32], sizes = [8, 32], strides = [1, 1]} : vector<8x128xf32> to vector<8x32xf32>
    %189 = arith.negf %188 : vector<8x32xf32>
    %190 = math.exp %189 : vector<8x32xf32>
    %cst_71 = arith.constant 1.000000e+00 : f32
    %191 = vector.broadcast %cst_71 : f32 to vector<8x32xf32>
    %192 = arith.addf %191, %190 : vector<8x32xf32>
    %193 = arith.divf %191, %192 : vector<8x32xf32>
    %194 = vector.extract_strided_slice %181 {offsets = [0, 64], sizes = [8, 32], strides = [1, 1]} : vector<8x128xf32> to vector<8x32xf32>
    %195 = math.tanh %194 : vector<8x32xf32>
    %196 = vector.extract_strided_slice %181 {offsets = [0, 96], sizes = [8, 32], strides = [1, 1]} : vector<8x128xf32> to vector<8x32xf32>
    %197 = arith.negf %196 : vector<8x32xf32>
    %198 = math.exp %197 : vector<8x32xf32>
    %cst_72 = arith.constant 1.000000e+00 : f32
    %199 = vector.broadcast %cst_72 : f32 to vector<8x32xf32>
    %200 = arith.addf %199, %198 : vector<8x32xf32>
    %201 = arith.divf %199, %200 : vector<8x32xf32>
    %202 = arith.mulf %193, %162 : vector<8x32xf32>
    %203 = arith.mulf %187, %195 : vector<8x32xf32>
    %204 = arith.addf %202, %203 : vector<8x32xf32>
    %205 = math.tanh %204 : vector<8x32xf32>
    %206 = arith.mulf %201, %205 : vector<8x32xf32>
    %207 = arith.truncf %206 : vector<8x32xf32> to vector<8x32xbf16>
    %208 = arith.index_cast %c4_i32 : i32 to index
    %c0_73 = arith.constant 0 : index
    %c0_74 = arith.constant 0 : index
    %209 = vector.load %arg4[%208, %c0_73, %c0_74] : memref<8x8x32xbf16, #tpu.memory_space<vmem>>, vector<1x8x32xbf16>
    %210 = vector.shape_cast %209 : vector<1x8x32xbf16> to vector<8x32xbf16>
    %211 = vector.shape_cast %207 : vector<8x32xbf16> to vector<1x8x32xbf16>
    tpu.vector_store %arg4[%208, %c0_73, %c0_74], %211 {strides = array<i32>} : memref<8x8x32xbf16, #tpu.memory_space<vmem>>, vector<1x8x32xbf16>,
    %c5_i32 = arith.constant 5 : i32
    %212 = arith.index_cast %c5_i32 : i32 to index
    %c0_75 = arith.constant 0 : index
    %c0_76 = arith.constant 0 : index
    %213 = vector.load %arg0[%212, %c0_75, %c0_76] : memref<8x8x16xbf16, #tpu.memory_space<vmem>>, vector<1x8x16xbf16>
    %214 = vector.shape_cast %213 : vector<1x8x16xbf16> to vector<8x16xbf16>
    %c0_77 = arith.constant 0 : index
    %c0_78 = arith.constant 0 : index
    %215 = vector.load %arg1[%c0_77, %c0_78] : memref<16x128xbf16, #tpu.memory_space<vmem>>, vector<16x128xbf16>
    %cst_79 = arith.constant dense<0.000000e+00> : vector<8x128xf32>
    %216 = tpu.matmul %214, %215, %cst_79 {dimension_numbers = #tpu.dot_dimension_numbers<[1], [0], [0], [1], [0, 0, 1, 1], [], []>} : vector<8x16xbf16>, vector<16x128xbf16>, vector<8x128xf32> -> vector<8x128xf32>
    %217 = arith.truncf %206 : vector<8x32xf32> to vector<8x32xbf16>
    %c0_80 = arith.constant 0 : index
    %c0_81 = arith.constant 0 : index
    %218 = vector.load %arg2[%c0_80, %c0_81] : memref<32x128xbf16, #tpu.memory_space<vmem>>, vector<32x128xbf16>
    %cst_82 = arith.constant dense<0.000000e+00> : vector<8x128xf32>
    %219 = tpu.matmul %217, %218, %cst_82 {dimension_numbers = #tpu.dot_dimension_numbers<[1], [0], [0], [1], [0, 0, 1, 1], [], []>} : vector<8x32xbf16>, vector<32x128xbf16>, vector<8x128xf32> -> vector<8x128xf32>
    %220 = arith.addf %216, %219 : vector<8x128xf32>
    %c0_83 = arith.constant 0 : index
    %c0_84 = arith.constant 0 : index
    %221 = vector.load %arg3[%c0_83, %c0_84] : memref<1x128xf32, #tpu.memory_space<vmem>>, vector<1x128xf32>
    %222 = vector.broadcast %221 : vector<1x128xf32> to vector<8x128xf32>
    %223 = arith.addf %220, %222 : vector<8x128xf32>
    %224 = vector.extract_strided_slice %223 {offsets = [0, 0], sizes = [8, 32], strides = [1, 1]} : vector<8x128xf32> to vector<8x32xf32>
    %225 = arith.negf %224 : vector<8x32xf32>
    %226 = math.exp %225 : vector<8x32xf32>
    %cst_85 = arith.constant 1.000000e+00 : f32
    %227 = vector.broadcast %cst_85 : f32 to vector<8x32xf32>
    %228 = arith.addf %227, %226 : vector<8x32xf32>
    %229 = arith.divf %227, %228 : vector<8x32xf32>
    %230 = vector.extract_strided_slice %223 {offsets = [0, 32], sizes = [8, 32], strides = [1, 1]} : vector<8x128xf32> to vector<8x32xf32>
    %231 = arith.negf %230 : vector<8x32xf32>
    %232 = math.exp %231 : vector<8x32xf32>
    %cst_86 = arith.constant 1.000000e+00 : f32
    %233 = vector.broadcast %cst_86 : f32 to vector<8x32xf32>
    %234 = arith.addf %233, %232 : vector<8x32xf32>
    %235 = arith.divf %233, %234 : vector<8x32xf32>
    %236 = vector.extract_strided_slice %223 {offsets = [0, 64], sizes = [8, 32], strides = [1, 1]} : vector<8x128xf32> to vector<8x32xf32>
    %237 = math.tanh %236 : vector<8x32xf32>
    %238 = vector.extract_strided_slice %223 {offsets = [0, 96], sizes = [8, 32], strides = [1, 1]} : vector<8x128xf32> to vector<8x32xf32>
    %239 = arith.negf %238 : vector<8x32xf32>
    %240 = math.exp %239 : vector<8x32xf32>
    %cst_87 = arith.constant 1.000000e+00 : f32
    %241 = vector.broadcast %cst_87 : f32 to vector<8x32xf32>
    %242 = arith.addf %241, %240 : vector<8x32xf32>
    %243 = arith.divf %241, %242 : vector<8x32xf32>
    %244 = arith.mulf %235, %204 : vector<8x32xf32>
    %245 = arith.mulf %229, %237 : vector<8x32xf32>
    %246 = arith.addf %244, %245 : vector<8x32xf32>
    %247 = math.tanh %246 : vector<8x32xf32>
    %248 = arith.mulf %243, %247 : vector<8x32xf32>
    %249 = arith.truncf %248 : vector<8x32xf32> to vector<8x32xbf16>
    %250 = arith.index_cast %c5_i32 : i32 to index
    %c0_88 = arith.constant 0 : index
    %c0_89 = arith.constant 0 : index
    %251 = vector.load %arg4[%250, %c0_88, %c0_89] : memref<8x8x32xbf16, #tpu.memory_space<vmem>>, vector<1x8x32xbf16>
    %252 = vector.shape_cast %251 : vector<1x8x32xbf16> to vector<8x32xbf16>
    %253 = vector.shape_cast %249 : vector<8x32xbf16> to vector<1x8x32xbf16>
    tpu.vector_store %arg4[%250, %c0_88, %c0_89], %253 {strides = array<i32>} : memref<8x8x32xbf16, #tpu.memory_space<vmem>>, vector<1x8x32xbf16>,
    %c6_i32 = arith.constant 6 : i32
    %254 = arith.index_cast %c6_i32 : i32 to index
    %c0_90 = arith.constant 0 : index
    %c0_91 = arith.constant 0 : index
    %255 = vector.load %arg0[%254, %c0_90, %c0_91] : memref<8x8x16xbf16, #tpu.memory_space<vmem>>, vector<1x8x16xbf16>
    %256 = vector.shape_cast %255 : vector<1x8x16xbf16> to vector<8x16xbf16>
    %c0_92 = arith.constant 0 : index
    %c0_93 = arith.constant 0 : index
    %257 = vector.load %arg1[%c0_92, %c0_93] : memref<16x128xbf16, #tpu.memory_space<vmem>>, vector<16x128xbf16>
    %cst_94 = arith.constant dense<0.000000e+00> : vector<8x128xf32>
    %258 = tpu.matmul %256, %257, %cst_94 {dimension_numbers = #tpu.dot_dimension_numbers<[1], [0], [0], [1], [0, 0, 1, 1], [], []>} : vector<8x16xbf16>, vector<16x128xbf16>, vector<8x128xf32> -> vector<8x128xf32>
    %259 = arith.truncf %248 : vector<8x32xf32> to vector<8x32xbf16>
    %c0_95 = arith.constant 0 : index
    %c0_96 = arith.constant 0 : index
    %260 = vector.load %arg2[%c0_95, %c0_96] : memref<32x128xbf16, #tpu.memory_space<vmem>>, vector<32x128xbf16>
    %cst_97 = arith.constant dense<0.000000e+00> : vector<8x128xf32>
    %261 = tpu.matmul %259, %260, %cst_97 {dimension_numbers = #tpu.dot_dimension_numbers<[1], [0], [0], [1], [0, 0, 1, 1], [], []>} : vector<8x32xbf16>, vector<32x128xbf16>, vector<8x128xf32> -> vector<8x128xf32>
    %262 = arith.addf %258, %261 : vector<8x128xf32>
    %c0_98 = arith.constant 0 : index
    %c0_99 = arith.constant 0 : index
    %263 = vector.load %arg3[%c0_98, %c0_99] : memref<1x128xf32, #tpu.memory_space<vmem>>, vector<1x128xf32>
    %264 = vector.broadcast %263 : vector<1x128xf32> to vector<8x128xf32>
    %265 = arith.addf %262, %264 : vector<8x128xf32>
    %266 = vector.extract_strided_slice %265 {offsets = [0, 0], sizes = [8, 32], strides = [1, 1]} : vector<8x128xf32> to vector<8x32xf32>
    %267 = arith.negf %266 : vector<8x32xf32>
    %268 = math.exp %267 : vector<8x32xf32>
    %cst_100 = arith.constant 1.000000e+00 : f32
    %269 = vector.broadcast %cst_100 : f32 to vector<8x32xf32>
    %270 = arith.addf %269, %268 : vector<8x32xf32>
    %271 = arith.divf %269, %270 : vector<8x32xf32>
    %272 = vector.extract_strided_slice %265 {offsets = [0, 32], sizes = [8, 32], strides = [1, 1]} : vector<8x128xf32> to vector<8x32xf32>
    %273 = arith.negf %272 : vector<8x32xf32>
    %274 = math.exp %273 : vector<8x32xf32>
    %cst_101 = arith.constant 1.000000e+00 : f32
    %275 = vector.broadcast %cst_101 : f32 to vector<8x32xf32>
    %276 = arith.addf %275, %274 : vector<8x32xf32>
    %277 = arith.divf %275, %276 : vector<8x32xf32>
    %278 = vector.extract_strided_slice %265 {offsets = [0, 64], sizes = [8, 32], strides = [1, 1]} : vector<8x128xf32> to vector<8x32xf32>
    %279 = math.tanh %278 : vector<8x32xf32>
    %280 = vector.extract_strided_slice %265 {offsets = [0, 96], sizes = [8, 32], strides = [1, 1]} : vector<8x128xf32> to vector<8x32xf32>
    %281 = arith.negf %280 : vector<8x32xf32>
    %282 = math.exp %281 : vector<8x32xf32>
    %cst_102 = arith.constant 1.000000e+00 : f32
    %283 = vector.broadcast %cst_102 : f32 to vector<8x32xf32>
    %284 = arith.addf %283, %282 : vector<8x32xf32>
    %285 = arith.divf %283, %284 : vector<8x32xf32>
    %286 = arith.mulf %277, %246 : vector<8x32xf32>
    %287 = arith.mulf %271, %279 : vector<8x32xf32>
    %288 = arith.addf %286, %287 : vector<8x32xf32>
    %289 = math.tanh %288 : vector<8x32xf32>
    %290 = arith.mulf %285, %289 : vector<8x32xf32>
    %291 = arith.truncf %290 : vector<8x32xf32> to vector<8x32xbf16>
    %292 = arith.index_cast %c6_i32 : i32 to index
    %c0_103 = arith.constant 0 : index
    %c0_104 = arith.constant 0 : index
    %293 = vector.load %arg4[%292, %c0_103, %c0_104] : memref<8x8x32xbf16, #tpu.memory_space<vmem>>, vector<1x8x32xbf16>
    %294 = vector.shape_cast %293 : vector<1x8x32xbf16> to vector<8x32xbf16>
    %295 = vector.shape_cast %291 : vector<8x32xbf16> to vector<1x8x32xbf16>
    tpu.vector_store %arg4[%292, %c0_103, %c0_104], %295 {strides = array<i32>} : memref<8x8x32xbf16, #tpu.memory_space<vmem>>, vector<1x8x32xbf16>,
    %c7_i32 = arith.constant 7 : i32
    %296 = arith.index_cast %c7_i32 : i32 to index
    %c0_105 = arith.constant 0 : index
    %c0_106 = arith.constant 0 : index
    %297 = vector.load %arg0[%296, %c0_105, %c0_106] : memref<8x8x16xbf16, #tpu.memory_space<vmem>>, vector<1x8x16xbf16>
    %298 = vector.shape_cast %297 : vector<1x8x16xbf16> to vector<8x16xbf16>
    %c0_107 = arith.constant 0 : index
    %c0_108 = arith.constant 0 : index
    %299 = vector.load %arg1[%c0_107, %c0_108] : memref<16x128xbf16, #tpu.memory_space<vmem>>, vector<16x128xbf16>
    %cst_109 = arith.constant dense<0.000000e+00> : vector<8x128xf32>
    %300 = tpu.matmul %298, %299, %cst_109 {dimension_numbers = #tpu.dot_dimension_numbers<[1], [0], [0], [1], [0, 0, 1, 1], [], []>} : vector<8x16xbf16>, vector<16x128xbf16>, vector<8x128xf32> -> vector<8x128xf32>
    %301 = arith.truncf %290 : vector<8x32xf32> to vector<8x32xbf16>
    %c0_110 = arith.constant 0 : index
    %c0_111 = arith.constant 0 : index
    %302 = vector.load %arg2[%c0_110, %c0_111] : memref<32x128xbf16, #tpu.memory_space<vmem>>, vector<32x128xbf16>
    %cst_112 = arith.constant dense<0.000000e+00> : vector<8x128xf32>
    %303 = tpu.matmul %301, %302, %cst_112 {dimension_numbers = #tpu.dot_dimension_numbers<[1], [0], [0], [1], [0, 0, 1, 1], [], []>} : vector<8x32xbf16>, vector<32x128xbf16>, vector<8x128xf32> -> vector<8x128xf32>
    %304 = arith.addf %300, %303 : vector<8x128xf32>
    %c0_113 = arith.constant 0 : index
    %c0_114 = arith.constant 0 : index
    %305 = vector.load %arg3[%c0_113, %c0_114] : memref<1x128xf32, #tpu.memory_space<vmem>>, vector<1x128xf32>
    %306 = vector.broadcast %305 : vector<1x128xf32> to vector<8x128xf32>
    %307 = arith.addf %304, %306 : vector<8x128xf32>
    %308 = vector.extract_strided_slice %307 {offsets = [0, 0], sizes = [8, 32], strides = [1, 1]} : vector<8x128xf32> to vector<8x32xf32>
    %309 = arith.negf %308 : vector<8x32xf32>
    %310 = math.exp %309 : vector<8x32xf32>
    %cst_115 = arith.constant 1.000000e+00 : f32
    %311 = vector.broadcast %cst_115 : f32 to vector<8x32xf32>
    %312 = arith.addf %311, %310 : vector<8x32xf32>
    %313 = arith.divf %311, %312 : vector<8x32xf32>
    %314 = vector.extract_strided_slice %307 {offsets = [0, 32], sizes = [8, 32], strides = [1, 1]} : vector<8x128xf32> to vector<8x32xf32>
    %315 = arith.negf %314 : vector<8x32xf32>
    %316 = math.exp %315 : vector<8x32xf32>
    %cst_116 = arith.constant 1.000000e+00 : f32
    %317 = vector.broadcast %cst_116 : f32 to vector<8x32xf32>
    %318 = arith.addf %317, %316 : vector<8x32xf32>
    %319 = arith.divf %317, %318 : vector<8x32xf32>
    %320 = vector.extract_strided_slice %307 {offsets = [0, 64], sizes = [8, 32], strides = [1, 1]} : vector<8x128xf32> to vector<8x32xf32>
    %321 = math.tanh %320 : vector<8x32xf32>
    %322 = vector.extract_strided_slice %307 {offsets = [0, 96], sizes = [8, 32], strides = [1, 1]} : vector<8x128xf32> to vector<8x32xf32>
    %323 = arith.negf %322 : vector<8x32xf32>
    %324 = math.exp %323 : vector<8x32xf32>
    %cst_117 = arith.constant 1.000000e+00 : f32
    %325 = vector.broadcast %cst_117 : f32 to vector<8x32xf32>
    %326 = arith.addf %325, %324 : vector<8x32xf32>
    %327 = arith.divf %325, %326 : vector<8x32xf32>
    %328 = arith.mulf %319, %288 : vector<8x32xf32>
    %329 = arith.mulf %313, %321 : vector<8x32xf32>
    %330 = arith.addf %328, %329 : vector<8x32xf32>
    %331 = math.tanh %330 : vector<8x32xf32>
    %332 = arith.mulf %327, %331 : vector<8x32xf32>
    %333 = arith.truncf %332 : vector<8x32xf32> to vector<8x32xbf16>
    %334 = arith.index_cast %c7_i32 : i32 to index
    %c0_118 = arith.constant 0 : index
    %c0_119 = arith.constant 0 : index
    %335 = vector.load %arg4[%334, %c0_118, %c0_119] : memref<8x8x32xbf16, #tpu.memory_space<vmem>>, vector<1x8x32xbf16>
    %336 = vector.shape_cast %335 : vector<1x8x32xbf16> to vector<8x32xbf16>
    %337 = vector.shape_cast %333 : vector<8x32xbf16> to vector<1x8x32xbf16>
    tpu.vector_store %arg4[%334, %c0_118, %c0_119], %337 {strides = array<i32>} : memref<8x8x32xbf16, #tpu.memory_space<vmem>>, vector<1x8x32xbf16>,
    %c8_i32 = arith.constant 8 : i32
    %c0_120 = arith.constant 0 : index
    %c0_121 = arith.constant 0 : index
    %338 = vector.load %arg5[%c0_120, %c0_121] : memref<8x32xf32, #tpu.memory_space<vmem>>, vector<8x32xf32>
    tpu.vector_store %arg5[%c0_120, %c0_121], %332 {strides = array<i32>} : memref<8x32xf32, #tpu.memory_space<vmem>>, vector<8x32xf32>,
    %c0_122 = arith.constant 0 : index
    %c0_123 = arith.constant 0 : index
    %339 = vector.load %arg6[%c0_122, %c0_123] : memref<8x32xf32, #tpu.memory_space<vmem>>, vector<8x32xf32>
    tpu.vector_store %arg6[%c0_122, %c0_123], %330 {strides = array<i32>} : memref<8x32xf32, #tpu.memory_space<vmem>>, vector<8x32xf32>,
    return
  }
}

module attributes {stable_mosaic.version = 11 : i64} {
  func.func @fused_decoder_kernel(%arg0: i32, %arg1: memref<8xi32, #tpu.memory_space<smem>>, %arg2: memref<8x8x1xi32, #tpu.memory_space<vmem>>, %arg3: memref<8x32xf32, #tpu.memory_space<vmem>>, %arg4: memref<8x32xf32, #tpu.memory_space<vmem>>, %arg5: memref<8x8x32xbf16, #tpu.memory_space<vmem>>, %arg6: memref<16x16xbf16, #tpu.memory_space<vmem>>, %arg7: memref<80x128xbf16, #tpu.memory_space<vmem>>, %arg8: memref<1x128xf32, #tpu.memory_space<vmem>>, %arg9: memref<64x16xbf16, #tpu.memory_space<vmem>>, %arg10: memref<1x16xf32, #tpu.memory_space<vmem>>, %arg11: memref<8x8x16xf32, #tpu.memory_space<vmem>>, %arg12: memref<8x32xf32, #tpu.memory_space<vmem>>, %arg13: memref<8x32xf32, #tpu.memory_space<vmem>>, %arg14: memref<8x16xbf16, #tpu.memory_space<vmem>>) attributes {dimension_semantics = [#tpu.dimension_semantics<arbitrary>], iteration_bounds = array<i64: 8>, scalar_prefetch = 1 : i64, scratch_operands = 3 : i64, tpu.core_type = #tpu.core_type<tc>, window_params = [{pipeline_mode = #tpu.pipeline_mode<synchronous>, transform_indices = @transform_0, window_bounds = array<i64: 8, 8, 1>}, {pipeline_mode = #tpu.pipeline_mode<synchronous>, transform_indices = @transform_1, window_bounds = array<i64: 8, 32>}, {pipeline_mode = #tpu.pipeline_mode<synchronous>, transform_indices = @transform_2, window_bounds = array<i64: 8, 32>}, {pipeline_mode = #tpu.pipeline_mode<synchronous>, transform_indices = @transform_3, window_bounds = array<i64: 8, 8, 32>}, {pipeline_mode = #tpu.pipeline_mode<synchronous>, transform_indices = @transform_4, window_bounds = array<i64: 16, 16>}, {pipeline_mode = #tpu.pipeline_mode<synchronous>, transform_indices = @transform_5, window_bounds = array<i64: 80, 128>}, {pipeline_mode = #tpu.pipeline_mode<synchronous>, transform_indices = @transform_6, window_bounds = array<i64: 1, 128>}, {pipeline_mode = #tpu.pipeline_mode<synchronous>, transform_indices = @transform_7, window_bounds = array<i64: 64, 16>}, {pipeline_mode = #tpu.pipeline_mode<synchronous>, transform_indices = @transform_8, window_bounds = array<i64: 1, 16>}, {pipeline_mode = #tpu.pipeline_mode<synchronous>, transform_indices = @transform_9, window_bounds = array<i64: 8, 8, 16>}]} {
    %c0_i32 = arith.constant 0 : i32
    %0 = arith.cmpi eq, %arg0, %c0_i32 : i32
    %1 = arith.extui %0 : i1 to i32
    %c0_i32_0 = arith.constant 0 : i32
    %2 = arith.cmpi ne, %1, %c0_i32_0 : i32
    scf.if %2 {
      %c0 = arith.constant 0 : index
      %c0_3 = arith.constant 0 : index
      %6 = vector.load %arg3[%c0, %c0_3] : memref<8x32xf32, #tpu.memory_space<vmem>>, vector<8x32xf32>
      %c0_4 = arith.constant 0 : index
      %c0_5 = arith.constant 0 : index
      %7 = vector.load %arg12[%c0_4, %c0_5] : memref<8x32xf32, #tpu.memory_space<vmem>>, vector<8x32xf32>
      tpu.vector_store %arg12[%c0_4, %c0_5], %6 {strides = array<i32>} : memref<8x32xf32, #tpu.memory_space<vmem>>, vector<8x32xf32>,
      %c0_6 = arith.constant 0 : index
      %c0_7 = arith.constant 0 : index
      %8 = vector.load %arg4[%c0_6, %c0_7] : memref<8x32xf32, #tpu.memory_space<vmem>>, vector<8x32xf32>
      %c0_8 = arith.constant 0 : index
      %c0_9 = arith.constant 0 : index
      %9 = vector.load %arg13[%c0_8, %c0_9] : memref<8x32xf32, #tpu.memory_space<vmem>>, vector<8x32xf32>
      tpu.vector_store %arg13[%c0_8, %c0_9], %8 {strides = array<i32>} : memref<8x32xf32, #tpu.memory_space<vmem>>, vector<8x32xf32>,
      %c0_10 = arith.constant 0 : index
      %c0_11 = arith.constant 0 : index
      %c0_12 = arith.constant 0 : index
      %10 = vector.load %arg2[%c0_10, %c0_11, %c0_12] : memref<8x8x1xi32, #tpu.memory_space<vmem>>, vector<1x8x1xi32>
      %11 = vector.shape_cast %10 : vector<1x8x1xi32> to vector<8x1xi32>
      %12 = tpu.iota {dimensions = array<i32: 1>} : vector<8x16xi32>
      %13 = vector.broadcast %11 : vector<8x1xi32> to vector<8x16xi32>
      %14 = arith.cmpi eq, %12, %13 : vector<8x16xi32>
      %15 = arith.extui %14 : vector<8x16xi1> to vector<8x16xi32>
      %16 = arith.sitofp %15 : vector<8x16xi32> to vector<8x16xf32>
      %17 = arith.truncf %16 : vector<8x16xf32> to vector<8x16xbf16>
      %c0_13 = arith.constant 0 : index
      %c0_14 = arith.constant 0 : index
      %18 = vector.load %arg6[%c0_13, %c0_14] : memref<16x16xbf16, #tpu.memory_space<vmem>>, vector<16x16xbf16>
      %cst = arith.constant dense<0.000000e+00> : vector<8x16xf32>
      %19 = tpu.matmul %17, %18, %cst {dimension_numbers = #tpu.dot_dimension_numbers<[1], [0], [0], [1], [0, 0, 1, 1], [], []>} : vector<8x16xbf16>, vector<16x16xbf16>, vector<8x16xf32> -> vector<8x16xf32>
      %20 = arith.truncf %19 : vector<8x16xf32> to vector<8x16xbf16>
      %c0_15 = arith.constant 0 : index
      %c0_16 = arith.constant 0 : index
      %21 = vector.load %arg14[%c0_15, %c0_16] : memref<8x16xbf16, #tpu.memory_space<vmem>>, vector<8x16xbf16>
      tpu.vector_store %arg14[%c0_15, %c0_16], %20 {strides = array<i32>} : memref<8x16xbf16, #tpu.memory_space<vmem>>, vector<8x16xbf16>,
      %cst_17 = arith.constant 0.000000e+00 : f32
      %22 = vector.broadcast %cst_17 : f32 to vector<8x16xf32>
      %c0_18 = arith.constant 0 : index
      %c0_19 = arith.constant 0 : index
      %c0_20 = arith.constant 0 : index
      %23 = vector.load %arg11[%c0_18, %c0_19, %c0_20] : memref<8x8x16xf32, #tpu.memory_space<vmem>>, vector<1x8x16xf32>
      %24 = vector.shape_cast %23 : vector<1x8x16xf32> to vector<8x16xf32>
      %25 = vector.shape_cast %22 : vector<8x16xf32> to vector<1x8x16xf32>
      tpu.vector_store %arg11[%c0_18, %c0_19, %c0_20], %25 {strides = array<i32>} : memref<8x8x16xf32, #tpu.memory_space<vmem>>, vector<1x8x16xf32>,
    } else {
    }
    %c0_i32_1 = arith.constant 0 : i32
    %3 = arith.cmpi sgt, %arg0, %c0_i32_1 : i32
    %4 = arith.extui %3 : i1 to i32
    %c0_i32_2 = arith.constant 0 : i32
    %5 = arith.cmpi ne, %4, %c0_i32_2 : i32
    scf.if %5 {
      %c0 = arith.constant 0 : index
      %c0_3 = arith.constant 0 : index
      %6 = vector.load %arg12[%c0, %c0_3] : memref<8x32xf32, #tpu.memory_space<vmem>>, vector<8x32xf32>
      %c0_4 = arith.constant 0 : index
      %c0_5 = arith.constant 0 : index
      %7 = vector.load %arg13[%c0_4, %c0_5] : memref<8x32xf32, #tpu.memory_space<vmem>>, vector<8x32xf32>
      %8 = arith.truncf %6 : vector<8x32xf32> to vector<8x32xbf16>
      %c0_6 = arith.constant 0 : index
      %c0_7 = arith.constant 0 : index
      %c0_8 = arith.constant 0 : index
      %9 = vector.load %arg5[%c0_6, %c0_7, %c0_8] : memref<8x8x32xbf16, #tpu.memory_space<vmem>>, vector<8x8x32xbf16>
      %10 = vector.shape_cast %8 : vector<8x32xbf16> to vector<8x1x32xbf16>
      "tpu.trace_start"() <{level = 10 : i32, message = "bqh,bsh->bqs"}> : () -> ()
      %cst = arith.constant dense<0.000000e+00> : vector<8x1x8xf32>
      %11 = tpu.matmul %10, %9, %cst {dimension_numbers = #tpu.dot_dimension_numbers<[2], [2], [1], [1], [0, 0, 0, 1, 1, 1], [0], [0]>} : vector<8x1x32xbf16>, vector<8x8x32xbf16>, vector<8x1x8xf32> -> vector<8x1x8xf32>
      "tpu.trace_stop"() : () -> ()
      %cst_9 = arith.constant dense<0xFF800000> : vector<8x1xf32>
      %12 = vector.multi_reduction <maximumf>, %11, %cst_9 [2] : vector<8x1x8xf32> to vector<8x1xf32>
      %13 = vector.shape_cast %12 : vector<8x1xf32> to vector<8x1x1xf32>
      %14 = vector.broadcast %13 : vector<8x1x1xf32> to vector<8x1x8xf32>
      %15 = arith.subf %11, %14 : vector<8x1x8xf32>
      %16 = math.exp %15 : vector<8x1x8xf32>
      %cst_10 = arith.constant dense<0.000000e+00> : vector<8x1xf32>
      %17 = vector.multi_reduction <add>, %16, %cst_10 [2] : vector<8x1x8xf32> to vector<8x1xf32>
      %18 = vector.shape_cast %17 : vector<8x1xf32> to vector<8x1x1xf32>
      %19 = vector.broadcast %18 : vector<8x1x1xf32> to vector<8x1x8xf32>
      %20 = arith.divf %16, %19 : vector<8x1x8xf32>
      %21 = arith.truncf %20 : vector<8x1x8xf32> to vector<8x1x8xbf16>
      "tpu.trace_start"() <{level = 10 : i32, message = "bqs,bsh->bqh"}> : () -> ()
      %cst_11 = arith.constant dense<0.000000e+00> : vector<8x1x32xf32>
      %22 = tpu.matmul %21, %9, %cst_11 {dimension_numbers = #tpu.dot_dimension_numbers<[2], [1], [1], [2], [0, 0, 0, 1, 1, 2], [0], [0]>} : vector<8x1x8xbf16>, vector<8x8x32xbf16>, vector<8x1x32xf32> -> vector<8x1x32xf32>
      "tpu.trace_stop"() : () -> ()
      %23 = vector.shape_cast %22 : vector<8x1x32xf32> to vector<8x32xf32>
      %24 = arith.truncf %23 : vector<8x32xf32> to vector<8x32xbf16>
      %c0_12 = arith.constant 0 : index
      %c0_13 = arith.constant 0 : index
      %25 = vector.load %arg14[%c0_12, %c0_13] : memref<8x16xbf16, #tpu.memory_space<vmem>>, vector<8x16xbf16>
      %26 = tpu.concatenate %25, %24, %8 in 1 : vector<8x16xbf16>, vector<8x32xbf16>, vector<8x32xbf16> -> vector<8x80xbf16>
      %c0_14 = arith.constant 0 : index
      %c0_15 = arith.constant 0 : index
      %27 = vector.load %arg7[%c0_14, %c0_15] : memref<80x128xbf16, #tpu.memory_space<vmem>>, vector<80x128xbf16>
      %cst_16 = arith.constant dense<0.000000e+00> : vector<8x128xf32>
      %28 = tpu.matmul %26, %27, %cst_16 {dimension_numbers = #tpu.dot_dimension_numbers<[1], [0], [0], [1], [0, 0, 1, 1], [], []>} : vector<8x80xbf16>, vector<80x128xbf16>, vector<8x128xf32> -> vector<8x128xf32>
      %c0_17 = arith.constant 0 : index
      %c0_18 = arith.constant 0 : index
      %29 = vector.load %arg8[%c0_17, %c0_18] : memref<1x128xf32, #tpu.memory_space<vmem>>, vector<1x128xf32>
      %30 = vector.broadcast %29 : vector<1x128xf32> to vector<8x128xf32>
      %31 = arith.addf %28, %30 : vector<8x128xf32>
      %32 = vector.extract_strided_slice %31 {offsets = [0, 0], sizes = [8, 32], strides = [1, 1]} : vector<8x128xf32> to vector<8x32xf32>
      %33 = arith.negf %32 : vector<8x32xf32>
      %34 = math.exp %33 : vector<8x32xf32>
      %cst_19 = arith.constant 1.000000e+00 : f32
      %35 = vector.broadcast %cst_19 : f32 to vector<8x32xf32>
      %36 = arith.addf %35, %34 : vector<8x32xf32>
      %37 = arith.divf %35, %36 : vector<8x32xf32>
      %38 = vector.extract_strided_slice %31 {offsets = [0, 32], sizes = [8, 32], strides = [1, 1]} : vector<8x128xf32> to vector<8x32xf32>
      %39 = arith.negf %38 : vector<8x32xf32>
      %40 = math.exp %39 : vector<8x32xf32>
      %cst_20 = arith.constant 1.000000e+00 : f32
      %41 = vector.broadcast %cst_20 : f32 to vector<8x32xf32>
      %42 = arith.addf %41, %40 : vector<8x32xf32>
      %43 = arith.divf %41, %42 : vector<8x32xf32>
      %44 = vector.extract_strided_slice %31 {offsets = [0, 64], sizes = [8, 32], strides = [1, 1]} : vector<8x128xf32> to vector<8x32xf32>
      %45 = math.tanh %44 : vector<8x32xf32>
      %46 = vector.extract_strided_slice %31 {offsets = [0, 96], sizes = [8, 32], strides = [1, 1]} : vector<8x128xf32> to vector<8x32xf32>
      %47 = arith.negf %46 : vector<8x32xf32>
      %48 = math.exp %47 : vector<8x32xf32>
      %cst_21 = arith.constant 1.000000e+00 : f32
      %49 = vector.broadcast %cst_21 : f32 to vector<8x32xf32>
      %50 = arith.addf %49, %48 : vector<8x32xf32>
      %51 = arith.divf %49, %50 : vector<8x32xf32>
      %52 = arith.mulf %43, %7 : vector<8x32xf32>
      %53 = arith.mulf %37, %45 : vector<8x32xf32>
      %54 = arith.addf %52, %53 : vector<8x32xf32>
      %55 = math.tanh %54 : vector<8x32xf32>
      %56 = arith.mulf %51, %55 : vector<8x32xf32>
      %57 = arith.truncf %56 : vector<8x32xf32> to vector<8x32xbf16>
      %58 = tpu.concatenate %57, %24 in 1 : vector<8x32xbf16>, vector<8x32xbf16> -> vector<8x64xbf16>
      %c0_22 = arith.constant 0 : index
      %c0_23 = arith.constant 0 : index
      %59 = vector.load %arg9[%c0_22, %c0_23] : memref<64x16xbf16, #tpu.memory_space<vmem>>, vector<64x16xbf16>
      %cst_24 = arith.constant dense<0.000000e+00> : vector<8x16xf32>
      %60 = tpu.matmul %58, %59, %cst_24 {dimension_numbers = #tpu.dot_dimension_numbers<[1], [0], [0], [1], [0, 0, 1, 1], [], []>} : vector<8x64xbf16>, vector<64x16xbf16>, vector<8x16xf32> -> vector<8x16xf32>
      %c0_25 = arith.constant 0 : index
      %c0_26 = arith.constant 0 : index
      %61 = vector.load %arg10[%c0_25, %c0_26] : memref<1x16xf32, #tpu.memory_space<vmem>>, vector<1x16xf32>
      %62 = vector.broadcast %61 : vector<1x16xf32> to vector<8x16xf32>
      %63 = arith.addf %60, %62 : vector<8x16xf32>
      %64 = arith.index_cast %arg0 : i32 to index
      %c0_27 = arith.constant 0 : index
      %c0_28 = arith.constant 0 : index
      %65 = vector.load %arg11[%64, %c0_27, %c0_28] : memref<8x8x16xf32, #tpu.memory_space<vmem>>, vector<1x8x16xf32>
      %66 = vector.shape_cast %65 : vector<1x8x16xf32> to vector<8x16xf32>
      %67 = vector.shape_cast %63 : vector<8x16xf32> to vector<1x8x16xf32>
      tpu.vector_store %arg11[%64, %c0_27, %c0_28], %67 {strides = array<i32>} : memref<8x8x16xf32, #tpu.memory_space<vmem>>, vector<1x8x16xf32>,
      %c0_29 = arith.constant 0 : index
      %c0_30 = arith.constant 0 : index
      %68 = vector.load %arg12[%c0_29, %c0_30] : memref<8x32xf32, #tpu.memory_space<vmem>>, vector<8x32xf32>
      tpu.vector_store %arg12[%c0_29, %c0_30], %56 {strides = array<i32>} : memref<8x32xf32, #tpu.memory_space<vmem>>, vector<8x32xf32>,
      %c0_31 = arith.constant 0 : index
      %c0_32 = arith.constant 0 : index
      %69 = vector.load %arg13[%c0_31, %c0_32] : memref<8x32xf32, #tpu.memory_space<vmem>>, vector<8x32xf32>
      tpu.vector_store %arg13[%c0_31, %c0_32], %54 {strides = array<i32>} : memref<8x32xf32, #tpu.memory_space<vmem>>, vector<8x32xf32>,
      %c7_i32 = arith.constant 7 : i32
      %70 = arith.cmpi slt, %arg0, %c7_i32 : i32
      %71 = arith.extui %70 : i1 to i32
      %c0_i32_33 = arith.constant 0 : i32
      %72 = arith.cmpi ne, %71, %c0_i32_33 : i32
      scf.if %72 {
        %73 = tpu.iota {dimensions = array<i32: 1>} : vector<8x16xi32>
        %cst_34 = arith.constant dense<0xFF800000> : vector<8xf32>
        %74 = vector.multi_reduction <maximumf>, %63, %cst_34 [1] : vector<8x16xf32> to vector<8xf32>
        %75 = vector.shape_cast %74 : vector<8xf32> to vector<8x1xf32>
        %76 = vector.broadcast %75 : vector<8x1xf32> to vector<8x16xf32>
        %77 = arith.cmpf oge, %63, %76 : vector<8x16xf32>
        %c16_i32 = arith.constant 16 : i32
        %78 = vector.broadcast %c16_i32 : i32 to vector<8x16xi32>
        %79 = arith.select %77, %73, %78 : vector<8x16xi1>, vector<8x16xi32>
        %cst_35 = arith.constant dense<2147483647> : vector<8xi32>
        %80 = vector.multi_reduction <minsi>, %79, %cst_35 [1] : vector<8x16xi32> to vector<8xi32>
        %81 = vector.shape_cast %80 : vector<8xi32> to vector<8x1xi32>
        %82 = arith.index_cast %arg0 : i32 to index
        %83 = memref.load %arg1[%82] : memref<8xi32, #tpu.memory_space<smem>>
        %c0_i32_36 = arith.constant 0 : i32
        %84 = arith.cmpi sgt, %83, %c0_i32_36 : i32
        %85 = arith.index_cast %arg0 : i32 to index
        %c0_37 = arith.constant 0 : index
        %c0_38 = arith.constant 0 : index
        %86 = vector.load %arg2[%85, %c0_37, %c0_38] : memref<8x8x1xi32, #tpu.memory_space<vmem>>, vector<1x8x1xi32>
        %87 = vector.shape_cast %86 : vector<1x8x1xi32> to vector<8x1xi32>
        %88 = arith.select %84, %87, %81 : vector<8x1xi32>
        %89 = tpu.iota {dimensions = array<i32: 1>} : vector<8x16xi32>
        %90 = vector.broadcast %88 : vector<8x1xi32> to vector<8x16xi32>
        %91 = arith.cmpi eq, %89, %90 : vector<8x16xi32>
        %92 = arith.extui %91 : vector<8x16xi1> to vector<8x16xi32>
        %93 = arith.sitofp %92 : vector<8x16xi32> to vector<8x16xf32>
        %94 = arith.truncf %93 : vector<8x16xf32> to vector<8x16xbf16>
        %c0_39 = arith.constant 0 : index
        %c0_40 = arith.constant 0 : index
        %95 = vector.load %arg6[%c0_39, %c0_40] : memref<16x16xbf16, #tpu.memory_space<vmem>>, vector<16x16xbf16>
        %cst_41 = arith.constant dense<0.000000e+00> : vector<8x16xf32>
        %96 = tpu.matmul %94, %95, %cst_41 {dimension_numbers = #tpu.dot_dimension_numbers<[1], [0], [0], [1], [0, 0, 1, 1], [], []>} : vector<8x16xbf16>, vector<16x16xbf16>, vector<8x16xf32> -> vector<8x16xf32>
        %97 = arith.truncf %96 : vector<8x16xf32> to vector<8x16xbf16>
        %c0_42 = arith.constant 0 : index
        %c0_43 = arith.constant 0 : index
        %98 = vector.load %arg14[%c0_42, %c0_43] : memref<8x16xbf16, #tpu.memory_space<vmem>>, vector<8x16xbf16>
        tpu.vector_store %arg14[%c0_42, %c0_43], %97 {strides = array<i32>} : memref<8x16xbf16, #tpu.memory_space<vmem>>, vector<8x16xbf16>,
      } else {
      }
    } else {
    }
    return
  }
  func.func @transform_0(%arg0: i32, %arg1: memref<8xi32, #tpu.memory_space<smem>>) -> (i32, i32, i32) {
    %c0_i32 = arith.constant 0 : i32
    %c0_i32_0 = arith.constant 0 : i32
    %c0_i32_1 = arith.constant 0 : i32
    %c0_i32_2 = arith.constant 0 : i32
    return %c0_i32, %c0_i32_0, %c0_i32_1 : i32, i32, i32
  }
  func.func @transform_1(%arg0: i32, %arg1: memref<8xi32, #tpu.memory_space<smem>>) -> (i32, i32) {
    %c0_i32 = arith.constant 0 : i32
    %c0_i32_0 = arith.constant 0 : i32
    %c0_i32_1 = arith.constant 0 : i32
    return %c0_i32, %c0_i32_0 : i32, i32
  }
  func.func @transform_2(%arg0: i32, %arg1: memref<8xi32, #tpu.memory_space<smem>>) -> (i32, i32) {
    %c0_i32 = arith.constant 0 : i32
    %c0_i32_0 = arith.constant 0 : i32
    %c0_i32_1 = arith.constant 0 : i32
    return %c0_i32, %c0_i32_0 : i32, i32
  }
  func.func @transform_3(%arg0: i32, %arg1: memref<8xi32, #tpu.memory_space<smem>>) -> (i32, i32, i32) {
    %c0_i32 = arith.constant 0 : i32
    %c0_i32_0 = arith.constant 0 : i32
    %c0_i32_1 = arith.constant 0 : i32
    %c0_i32_2 = arith.constant 0 : i32
    return %c0_i32, %c0_i32_0, %c0_i32_1 : i32, i32, i32
  }
  func.func @transform_4(%arg0: i32, %arg1: memref<8xi32, #tpu.memory_space<smem>>) -> (i32, i32) {
    %c0_i32 = arith.constant 0 : i32
    %c0_i32_0 = arith.constant 0 : i32
    %c0_i32_1 = arith.constant 0 : i32
    return %c0_i32, %c0_i32_0 : i32, i32
  }
  func.func @transform_5(%arg0: i32, %arg1: memref<8xi32, #tpu.memory_space<smem>>) -> (i32, i32) {
    %c0_i32 = arith.constant 0 : i32
    %c0_i32_0 = arith.constant 0 : i32
    %c0_i32_1 = arith.constant 0 : i32
    return %c0_i32, %c0_i32_0 : i32, i32
  }
  func.func @transform_6(%arg0: i32, %arg1: memref<8xi32, #tpu.memory_space<smem>>) -> (i32, i32) {
    %c0_i32 = arith.constant 0 : i32
    %c0_i32_0 = arith.constant 0 : i32
    %c0_i32_1 = arith.constant 0 : i32
    return %c0_i32, %c0_i32_0 : i32, i32
  }
  func.func @transform_7(%arg0: i32, %arg1: memref<8xi32, #tpu.memory_space<smem>>) -> (i32, i32) {
    %c0_i32 = arith.constant 0 : i32
    %c0_i32_0 = arith.constant 0 : i32
    %c0_i32_1 = arith.constant 0 : i32
    return %c0_i32, %c0_i32_0 : i32, i32
  }
  func.func @transform_8(%arg0: i32, %arg1: memref<8xi32, #tpu.memory_space<smem>>) -> (i32, i32) {
    %c0_i32 = arith.constant 0 : i32
    %c0_i32_0 = arith.constant 0 : i32
    %c0_i32_1 = arith.constant 0 : i32
    return %c0_i32, %c0_i32_0 : i32, i32
  }
  func.func @transform_9(%arg0: i32, %arg1: memref<8xi32, #tpu.memory_space<smem>>) -> (i32, i32, i32) {
    %c0_i32 = arith.constant 0 : i32
    %c0_i32_0 = arith.constant 0 : i32
    %c0_i32_1 = arith.constant 0 : i32
    %c0_i32_2 = arith.constant 0 : i32
    return %c0_i32, %c0_i32_0, %c0_i32_1 : i32, i32, i32
  }
}

</mosaic_0001>

<bundles_post_ra>
// kernel: _forward.2
= control target key start
LH: loop header
LB: loop body
LE: loop exit
PB: predicated region body
PF: predicated region fallthrough
CT: control target
= control target key end

     0   :  { %v1613_v0 = vmov 0.0   ;;  %vm1614_vm0 = vmmov 0   ;;  %vm90_vm1 = vcmask 130048   ;;  %v1615_v5 = vmov 0   ;;  %s1616_s7 = smov 64   ;;  %s1618_s26 = smov 96   ;;  %s1938_s2 = inlined_call_operand.vmem [shape: bf16[32,128], index: 2, kind: input, shape index: {}]   ;;  %s1939_s1 = inlined_call_operand.vmem [shape: bf16[16,128], index: 1, kind: input, shape index: {}]   ;;  %s1940_s0 = inlined_call_operand.vmem [shape: bf16[8,8,16], index: 0, kind: input, shape index: {}]   ;;  %s1941_s3 = inlined_call_operand.vmem [shape: f32[1,128], index: 3, kind: input, shape index: {}]   ;;  %s1942_s4 = inlined_call_operand.vmem [shape: bf16[8,8,32], index: 4, kind: output, shape index: {0}]   ;;  %s1943_s5 = inlined_call_operand.vmem [shape: f32[8,32], index: 5, kind: output, shape index: {1}]   ;;  %s1944_s6 = inlined_call_operand.vmem [shape: f32[8,32], index: 6, kind: output, shape index: {2}]  }
   0x1   :  { %1407 = vmatprep.subr.bf16.mxu0 %v1613_v0  ;;  %1415 = vmatprep.subr.bf16.mxu1 %v1613_v0  ;;  %v1525_v1 = vld [vmem:[%s1938_s2 + $0x8] sm:$0xff]   ;;  %v1526_v2 = vld [vmem:[%s1939_s1] sm:$0xff]   ;;  %vm40_vm2 = vcmask 261120   ;;  %vm173_vm3 = vcmask 257024  }
   0x2   :  { %1417 = vmatprep.mubr.msk.bf16.mxu1 %vm1614_vm0, %v1613_v0  ;;  %1411 = vmatprep.mubr.msk.bf16.mxu0 %vm1614_vm0, %v1613_v0  ;;  %v21_v3 = vld [vmem:[%s1940_s0] sm:$0xf]  ;;  %v1529_v28 = vld [vmem:[%s1938_s2 + $0x8] sm:$0xff]   ;;  %v1289_v29 = vld [vmem:[%s1940_s0 + $0x4] sm:$0xf] }
   0x3   :  { %1408 = vmatpush3.bf16.msra.mxu0 %v1525_v1  ;;  %1416 = vmatpush3.bf16.msra.mxu1 %v1526_v2  ;;  %v1527_v4 = vld [vmem:[%s1938_s2] sm:$0xff]   ;;  %v1532_v57 = vld [vmem:[%s1938_s2 + $0x8] sm:$0xff]  }
   0x4   :  { %1409 = vmatprep.subr.bf16.mxu0 %v1613_v0  ;;  %1421 = vmatprep.subr.bf16.mxu1 %v1613_v0  ;;  %v1683_v9 = vld [vmem:[%s1941_s3] ss:$0 sm:$0xff]  ;;  %s1617_s3 = smov 32   ;;  %v1299_v58 = vld [vmem:[%s1940_s0 + $0x8] sm:$0xf] }
   0x5   :  { %v1528_v27 = vld [vmem:[%s1939_s1] sm:$0xff]  }
   0x6   :  { %1418 = vmatmul.mubr.msk.bf16.vlgmr.msra.gmra.mxu1 %vm90_vm1, %v21_v3  ;;  %v1530_v30 = vld [vmem:[%s1938_s2] sm:$0xff]  }
   0x7   :  { %1410 = vmatpush3.bf16.msra.mxu0 %v1527_v4  ;;  %1425 = vmatprep.mubr.msk.bf16.mxu1 %vm1614_vm0, %v1613_v0  ;;  %v1531_v56 = vld [vmem:[%s1939_s1] sm:$0xff]  }
   0x8   :  { %1429 = vmatprep.subr.bf16.mxu0 %v1613_v0  ;;  %1422 = vmatpush3.bf16.msra.mxu1 %v1529_v28  ;;  %v1533_v59 = vld [vmem:[%s1938_s2] sm:$0xff]  }
   0x9   :  { %1423 = vmatprep.subr.bf16.mxu1 %v1613_v0 }
   0xa   :  { %1412 = vmatmul.mubr.bf16.vlgmr.msra.gmra.mxu0 %v1615_v5 }
   0xb   :  { %1431 = vmatprep.mubr.msk.bf16.mxu0 %vm1614_vm0, %v1613_v0  ;;  %1430 = vmatpush3.bf16.msra.mxu0 %v1528_v27 }
   0xc   :  { %1443 = vmatprep.subr.bf16.mxu0 %v1613_v0  ;;  %1424 = vmatpush3.bf16.msra.mxu1 %v1530_v30 }
   0xd   :  { %1435 = vmatprep.subr.bf16.mxu1 %v1613_v0 }
  0x12   :  { %1432 = vmatmul.mubr.msk.bf16.vlgmr.msra.gmra.mxu0 %vm90_vm1, %v1289_v29 }
  0x13   :  { %1445 = vmatprep.mubr.msk.bf16.mxu0 %vm1614_vm0, %v1613_v0  ;;  %1444 = vmatpush3.bf16.msra.mxu0 %v1531_v56  ;;  %v1539_v56 = vld [vmem:[%s1938_s2] sm:$0xff]  }
  0x14   :  { %1457 = vmatprep.subr.bf16.mxu0 %v1613_v0 }
  0x1a   :  { %1446 = vmatmul.mubr.msk.bf16.vlgmr.msra.gmra.mxu0 %vm90_vm1, %v1299_v58 }
  0x1b   :  { %1459 = vmatprep.mubr.msk.bf16.mxu0 %vm1614_vm0, %v1613_v0 }
  0xc6   :  { %v128_v6 = vpop.f32.mrf.mxu1 }
  0xc8   :  { %v1419_v7 = vpop.f32.mrf.mxu1 }
  0xca   :  { %v78_v8 = vpop.f32.mrf.mxu0  ;;  %v131_v11 = vpop.f32.mrf.mxu1 }
  0xcb   :  { %v129_v10 = vadd.f32 %v128_v6, %v78_v8 }
  0xcc   :  { %v1413_v12 = vpop.f32.mrf.mxu0  ;;  %v1420_v14 = vpop.f32.mrf.mxu1 }
  0xcd   :  { %v141_v13 = vadd.f32 %v1683_v9, %v129_v10 }
  0xce   :  { %v81_v15 = vpop.f32.mrf.mxu0 }
  0xcf   :  { %1549 = vtanh.f32 %v141_v13  ;;  %v1287_v18 = vmul.f32 -1.442695, %v141_v13 }
  0xd0   :  { %v1414_v16 = vpop.f32.mrf.mxu0 }
  0xd1   :  { %1551 = vpow2.f32 %v1287_v18 }
  0xd2   :  { %v283_v35 = vpop.f32.mrf.mxu0 }
  0xd4   :  { %v1433_v36 = vpop.f32.mrf.mxu0 }
  0xd6   :  { %v286_v37 = vpop.f32.mrf.mxu0 }
  0xd8   :  { %v1434_v38 = vpop.f32.mrf.mxu0 }
  0xda   :  { %v438_v1 = vpop.f32.mrf.mxu0 }
  0xdc   :  { %v1550_v17 = vpop.eup %1549  ;;  %v1447_v2 = vpop.f32.mrf.mxu0 }
  0xdd   :  { %151 = vrot.lane.b32.xlu0 %v1550_v17, %s1616_s7 }
  0xde   :  { %v1552_v19 = vpop.eup %1551  ;;  %v441_v3 = vpop.f32.mrf.mxu0 }
  0xdf   :  { %v145_v20 = vadd.f32 1.0, %v1552_v19 }
  0xe0   :  { %v1448_v4 = vpop.f32.mrf.mxu0 }
  0xe1   :  { %1553 = vrcp.f32 %v145_v20 }
  0xee   :  { %v1554_v21 = vpop.eup %1553 }
  0xef   :  { %v149_v24 = vmul.f32 0.0, %v1554_v21 }
 0x14f   :  { %v152_v22 = vpop.permute.xlu0 %151 }
 0x150   :  { %v154_v23 = vmul.f32 %v1554_v21, %v152_v22 }
 0x152   :  { %156 = vrot.lane.b32.xlu0 %v154_v23, %s1617_s3  ;;  %v1534_v23 = vld [vmem:[%s1939_s1] sm:$0xff]  }
 0x153   :  { %1458 = vmatpush3.bf16.msra.mxu0 %v1534_v23  ;;  %v1329_v23 = vld [vmem:[%s1940_s0 + $0x14] sm:$0xf] }
 0x154   :  { %1471 = vmatprep.subr.bf16.mxu0 %v1613_v0 }
 0x1c4   :  { %v157_v25 = vpop.permute.xlu0 %156 }
 0x1c5   :  { %v159_v26 = vadd.f32 %v157_v25, %v149_v24  ;;  %v1535_v24 = vld [vmem:[%s1938_s2 + $0x8] sm:$0xff]  }
 0x1c6   :  { %v1309_v25 = vld [vmem:[%s1940_s0 + $0xc] sm:$0xf] }
 0x1c7   :  { %1555 = vtanh.f32 %v159_v26  ;;  %1460 = vmatmul.mubr.msk.bf16.vlgmr.msra.gmra.mxu0 %vm90_vm1, %v1309_v25 }
 0x1c8   :  { %1473 = vmatprep.mubr.msk.bf16.mxu0 %vm1614_vm0, %v1613_v0 }
 0x1d4   :  { %v1556_v31 = vpop.eup %1555 }
 0x1d5   :  { %162 = vrot.lane.b32.xlu1 %v1556_v31, %s1616_s7 }
 0x247   :  { %v163_v32 = vpop.permute.xlu1 %162 }
 0x248   :  { %v165_v33 = vmul.f32 %v1554_v21, %v163_v32 }
 0x24a   :  { %v1707_v34 = vpack.c.bf16 %v165_v33, %v165_v33 }
 0x24c   :  { %183 = vrot.lane.b32.xlu1 %v1707_v34, %s1617_s3 }
 0x287   :  { %v593_v31 = vpop.f32.mrf.mxu0 }
 0x289   :  { %v1461_v32 = vpop.f32.mrf.mxu0 }
 0x28b   :  { %v596_v33 = vpop.f32.mrf.mxu0 }
 0x2be   :  { %v184_v39 = vpop.permute.xlu1 %183 }
 0x2bf   :  { %1426 = vmatmul.mubr.msk.bf16.vlgmr.msra.gmra.mxu1 %vm40_vm2, %v184_v39 }
 0x2c0   :  { %1439 = vmatprep.mubr.msk.bf16.mxu1 %vm1614_vm0, %v1613_v0  ;;  %1436 = vmatpush3.bf16.msra.mxu1 %v1532_v57 }
 0x2c1   :  { %1437 = vmatprep.subr.bf16.mxu1 %v1613_v0 }
 0x2c4   :  { %1438 = vmatpush3.bf16.msra.mxu1 %v1533_v59 }
 0x2c5   :  { %1449 = vmatprep.subr.bf16.mxu1 %v1613_v0 }
 0x37f   :  { %v234_v40 = vpop.f32.mrf.mxu1 }
 0x380   :  { %v284_v41 = vadd.f32 %v283_v35, %v234_v40  ;;  %v1462_v35 = vpop.f32.mrf.mxu0 }
 0x381   :  { %v1427_v42 = vpop.f32.mrf.mxu1 }
 0x382   :  { %v296_v43 = vadd.f32 %v1683_v9, %v284_v41 }
 0x383   :  { %v237_v44 = vpop.f32.mrf.mxu1 }
 0x384   :  { %1557 = vtanh.f32 %v296_v43  ;;  %v1296_v47 = vmul.f32 -1.442695, %v296_v43 }
 0x385   :  { %v1428_v45 = vpop.f32.mrf.mxu1 }
 0x386   :  { %1559 = vpow2.f32 %v1296_v47 }
 0x391   :  { %v1558_v46 = vpop.eup %1557 }
 0x392   :  { %306 = vrot.lane.b32.xlu0 %v1558_v46, %s1616_s7 }
 0x393   :  { %v1560_v48 = vpop.eup %1559 }
 0x394   :  { %v300_v49 = vadd.f32 1.0, %v1560_v48 }
 0x396   :  { %1561 = vrcp.f32 %v300_v49 }
 0x3a3   :  { %v1562_v50 = vpop.eup %1561 }
 0x3a4   :  { %v304_v53 = vmul.f32 %v1562_v50, %v159_v26  ;;  %v1536_v26 = vld [vmem:[%s1938_s2] sm:$0xff]  }
 0x404   :  { %v307_v51 = vpop.permute.xlu0 %306 }
 0x405   :  { %v309_v52 = vmul.f32 %v1562_v50, %v307_v51 }
 0x407   :  { %311 = vrot.lane.b32.xlu1 %v309_v52, %s1617_s3 }
 0x479   :  { %v312_v54 = vpop.permute.xlu1 %311 }
 0x47a   :  { %v314_v55 = vadd.f32 %v312_v54, %v304_v53  ;;  %v1537_v53 = vld [vmem:[%s1939_s1] sm:$0xff]   ;;  %v1538_v54 = vld [vmem:[%s1938_s2 + $0x8] sm:$0xff]  }
 0x47b   :  { %1472 = vmatpush3.bf16.msra.mxu0 %v1537_v53  ;;  %v1544_v53 = vld [vmem:[%s1938_s2 + $0x8] sm:$0xff]  }
 0x47c   :  { %1563 = vtanh.f32 %v314_v55  ;;  %1485 = vmatprep.subr.bf16.mxu0 %v1613_v0 }
 0x489   :  { %v1564_v60 = vpop.eup %1563 }
 0x48a   :  { %317 = vrot.lane.b32.xlu0 %v1564_v60, %s1616_s7 }
 0x4fc   :  { %v318_v61 = vpop.permute.xlu0 %317 }
 0x4fd   :  { %v320_v62 = vmul.f32 %v1562_v50, %v318_v61 }
 0x4ff   :  { %v1736_v63 = vpack.c.bf16 %v320_v62, %v320_v62 }
 0x501   :  { %338 = vrot.lane.b32.xlu1 %v1736_v63, %s1617_s3 }
 0x573   :  { %v339_v5 = vpop.permute.xlu1 %338 }
 0x574   :  { %1440 = vmatmul.mubr.msk.bf16.vlgmr.msra.gmra.mxu1 %vm40_vm2, %v339_v5 }
 0x575   :  { %1453 = vmatprep.mubr.msk.bf16.mxu1 %vm1614_vm0, %v1613_v0  ;;  %1450 = vmatpush3.bf16.msra.mxu1 %v1535_v24  ;;  %v1542_v24 = vld [vmem:[%s1938_s2] sm:$0xff]  }
 0x576   :  { %1451 = vmatprep.subr.bf16.mxu1 %v1613_v0 }
 0x579   :  { %1452 = vmatpush3.bf16.msra.mxu1 %v1536_v26 }
 0x57a   :  { %1463 = vmatprep.subr.bf16.mxu1 %v1613_v0 }
 0x634   :  { %v389_v6 = vpop.f32.mrf.mxu1 }
 0x635   :  { %v439_v7 = vadd.f32 %v438_v1, %v389_v6 }
 0x636   :  { %v1441_v8 = vpop.f32.mrf.mxu1 }
 0x637   :  { %v451_v10 = vadd.f32 %v1683_v9, %v439_v7 }
 0x638   :  { %v392_v11 = vpop.f32.mrf.mxu1 }
 0x639   :  { %1565 = vtanh.f32 %v451_v10  ;;  %v1306_v14 = vmul.f32 -1.442695, %v451_v10 }
 0x63a   :  { %v1442_v12 = vpop.f32.mrf.mxu1 }
 0x63b   :  { %1567 = vpow2.f32 %v1306_v14 }
 0x646   :  { %v1566_v13 = vpop.eup %1565 }
 0x647   :  { %461 = vrot.lane.b32.xlu0 %v1566_v13, %s1616_s7 }
 0x648   :  { %v1568_v15 = vpop.eup %1567 }
 0x649   :  { %v455_v16 = vadd.f32 1.0, %v1568_v15 }
 0x64b   :  { %1569 = vrcp.f32 %v455_v16 }
 0x658   :  { %v1570_v17 = vpop.eup %1569 }
 0x659   :  { %v459_v20 = vmul.f32 %v1570_v17, %v314_v55  ;;  %v1319_v55 = vld [vmem:[%s1940_s0 + $0x10] sm:$0xf] }
 0x65a   :  { %1474 = vmatmul.mubr.msk.bf16.vlgmr.msra.gmra.mxu0 %vm90_vm1, %v1319_v55  ;;  %v1545_v55 = vld [vmem:[%s1938_s2] sm:$0xff]  }
 0x65b   :  { %1487 = vmatprep.mubr.msk.bf16.mxu0 %vm1614_vm0, %v1613_v0 }
 0x6b9   :  { %v462_v18 = vpop.permute.xlu0 %461 }
 0x6ba   :  { %v464_v19 = vmul.f32 %v1570_v17, %v462_v18 }
 0x6bc   :  { %466 = vrot.lane.b32.xlu1 %v464_v19, %s1617_s3 }
 0x71a   :  { %v748_v61 = vpop.f32.mrf.mxu0 }
 0x71c   :  { %v1475_v62 = vpop.f32.mrf.mxu0 }
 0x71e   :  { %v751_v1 = vpop.f32.mrf.mxu0 }
 0x720   :  { %v1476_v2 = vpop.f32.mrf.mxu0 }
 0x72e   :  { %v467_v21 = vpop.permute.xlu1 %466 }
 0x72f   :  { %v469_v22 = vadd.f32 %v467_v21, %v459_v20  ;;  %v1540_v21 = vld [vmem:[%s1939_s1] sm:$0xff]  }
 0x730   :  { %1486 = vmatpush3.bf16.msra.mxu0 %v1540_v21  ;;  %v1546_v21 = vld [vmem:[%s1939_s1] sm:$0xff]  }
 0x731   :  { %1571 = vtanh.f32 %v469_v22  ;;  %1499 = vmatprep.subr.bf16.mxu0 %v1613_v0 }
 0x733   :  { %1488 = vmatmul.mubr.msk.bf16.vlgmr.msra.gmra.mxu0 %vm90_vm1, %v1329_v23  ;;  %v1349_v23 = vld [vmem:[%s1940_s0 + $0x1c] sm:$0xf] }
 0x734   :  { %1501 = vmatprep.mubr.msk.bf16.mxu0 %vm1614_vm0, %v1613_v0 }
 0x73e   :  { %v1572_v27 = vpop.eup %1571 }
 0x73f   :  { %472 = vrot.lane.b32.xlu0 %v1572_v27, %s1616_s7 }
 0x7b1   :  { %v473_v28 = vpop.permute.xlu0 %472 }
 0x7b2   :  { %v475_v29 = vmul.f32 %v1570_v17, %v473_v28 }
 0x7b4   :  { %v1765_v30 = vpack.c.bf16 %v475_v29, %v475_v29 }
 0x7b6   :  { %493 = vrot.lane.b32.xlu1 %v1765_v30, %s1617_s3 }
 0x7f3   :  { %v903_v29 = vpop.f32.mrf.mxu0 }
 0x828   :  { %v494_v36 = vpop.permute.xlu1 %493 }
 0x829   :  { %1454 = vmatmul.mubr.msk.bf16.vlgmr.msra.gmra.mxu1 %vm40_vm2, %v494_v36 }
 0x82a   :  { %1467 = vmatprep.mubr.msk.bf16.mxu1 %vm1614_vm0, %v1613_v0  ;;  %1464 = vmatpush3.bf16.msra.mxu1 %v1538_v54  ;;  %v1339_v54 = vld [vmem:[%s1940_s0 + $0x18] sm:$0xf] }
 0x82b   :  { %1465 = vmatprep.subr.bf16.mxu1 %v1613_v0 }
 0x82e   :  { %1466 = vmatpush3.bf16.msra.mxu1 %v1539_v56 }
 0x82f   :  { %1477 = vmatprep.subr.bf16.mxu1 %v1613_v0 }
 0x8e9   :  { %v544_v37 = vpop.f32.mrf.mxu1 }
 0x8ea   :  { %v594_v38 = vadd.f32 %v593_v31, %v544_v37  ;;  %v1489_v31 = vpop.f32.mrf.mxu0 }
 0x8eb   :  { %v1455_v39 = vpop.f32.mrf.mxu1 }
 0x8ec   :  { %v606_v40 = vadd.f32 %v1683_v9, %v594_v38  ;;  %v906_v32 = vpop.f32.mrf.mxu0 }
 0x8ed   :  { %v547_v41 = vpop.f32.mrf.mxu1 }
 0x8ee   :  { %1573 = vtanh.f32 %v606_v40  ;;  %v1316_v44 = vmul.f32 -1.442695, %v606_v40  ;;  %v1490_v33 = vpop.f32.mrf.mxu0 }
 0x8ef   :  { %v1456_v42 = vpop.f32.mrf.mxu1 }
 0x8f0   :  { %1575 = vpow2.f32 %v1316_v44 }
 0x8fb   :  { %v1574_v43 = vpop.eup %1573 }
 0x8fc   :  { %616 = vrot.lane.b32.xlu0 %v1574_v43, %s1616_s7 }
 0x8fd   :  { %v1576_v45 = vpop.eup %1575 }
 0x8fe   :  { %v610_v46 = vadd.f32 1.0, %v1576_v45 }
 0x900   :  { %1577 = vrcp.f32 %v610_v46 }
 0x90d   :  { %v1578_v47 = vpop.eup %1577 }
 0x90e   :  { %v614_v50 = vmul.f32 %v1578_v47, %v469_v22  ;;  %v1541_v22 = vld [vmem:[%s1938_s2 + $0x8] sm:$0xff]  }
 0x96e   :  { %v617_v48 = vpop.permute.xlu0 %616 }
 0x96f   :  { %v619_v49 = vmul.f32 %v1578_v47, %v617_v48 }
 0x971   :  { %621 = vrot.lane.b32.xlu1 %v619_v49, %s1617_s3 }
 0x9e3   :  { %v622_v51 = vpop.permute.xlu1 %621 }
 0x9e4   :  { %v624_v52 = vadd.f32 %v622_v51, %v614_v50 }
 0x9e6   :  { %1579 = vtanh.f32 %v624_v52 }
 0x9f3   :  { %v1580_v57 = vpop.eup %1579 }
 0x9f4   :  { %627 = vrot.lane.b32.xlu0 %v1580_v57, %s1616_s7 }
 0xa66   :  { %v628_v58 = vpop.permute.xlu0 %627 }
 0xa67   :  { %v630_v59 = vmul.f32 %v1578_v47, %v628_v58 }
 0xa69   :  { %v1794_v60 = vpack.c.bf16 %v630_v59, %v630_v59 }
 0xa6b   :  { %648 = vrot.lane.b32.xlu1 %v1794_v60, %s1617_s3 }
 0xadd   :  { %v649_v3 = vpop.permute.xlu1 %648 }
 0xade   :  { %1468 = vmatmul.mubr.msk.bf16.vlgmr.msra.gmra.mxu1 %vm40_vm2, %v649_v3 }
 0xadf   :  { %1481 = vmatprep.mubr.msk.bf16.mxu1 %vm1614_vm0, %v1613_v0  ;;  %1478 = vmatpush3.bf16.msra.mxu1 %v1541_v22  ;;  %v1547_v22 = vld [vmem:[%s1938_s2 + $0x8] sm:$0xff]  }
 0xae0   :  { %1479 = vmatprep.subr.bf16.mxu1 %v1613_v0 }
 0xae3   :  { %1480 = vmatpush3.bf16.msra.mxu1 %v1542_v24  ;;  %v1548_v24 = vld [vmem:[%s1938_s2] sm:$0xff]  }
 0xae4   :  { %1491 = vmatprep.subr.bf16.mxu1 %v1613_v0 }
 0xb9e   :  { %v699_v4 = vpop.f32.mrf.mxu1 }
 0xb9f   :  { %v749_v5 = vadd.f32 %v748_v61, %v699_v4 }
 0xba0   :  { %v1469_v6 = vpop.f32.mrf.mxu1 }
 0xba1   :  { %v761_v7 = vadd.f32 %v1683_v9, %v749_v5 }
 0xba2   :  { %v702_v8 = vpop.f32.mrf.mxu1 }
 0xba3   :  { %1581 = vtanh.f32 %v761_v7  ;;  %v1326_v12 = vmul.f32 -1.442695, %v761_v7 }
 0xba4   :  { %v1470_v10 = vpop.f32.mrf.mxu1 }
 0xba5   :  { %1583 = vpow2.f32 %v1326_v12 }
 0xbb0   :  { %v1582_v11 = vpop.eup %1581 }
 0xbb1   :  { %771 = vrot.lane.b32.xlu0 %v1582_v11, %s1616_s7 }
 0xbb2   :  { %v1584_v13 = vpop.eup %1583 }
 0xbb3   :  { %v765_v14 = vadd.f32 1.0, %v1584_v13 }
 0xbb5   :  { %1585 = vrcp.f32 %v765_v14 }
 0xbc2   :  { %v1586_v15 = vpop.eup %1585 }
 0xbc3   :  { %v769_v18 = vmul.f32 %v1586_v15, %v624_v52  ;;  %v1543_v52 = vld [vmem:[%s1939_s1] sm:$0xff]  }
 0xbc4   :  { %1500 = vmatpush3.bf16.msra.mxu0 %v1543_v52 }
 0xbc5   :  { %1513 = vmatprep.subr.bf16.mxu0 %v1613_v0 }
 0xbc7   :  { %1502 = vmatmul.mubr.msk.bf16.vlgmr.msra.gmra.mxu0 %vm90_vm1, %v1339_v54 }
 0xbc8   :  { %1515 = vmatprep.mubr.msk.bf16.mxu0 %vm1614_vm0, %v1613_v0  ;;  %1514 = vmatpush3.bf16.msra.mxu0 %v1546_v21 }
 0xbcf   :  { %1516 = vmatmul.mubr.msk.bf16.vlgmr.msra.gmra.mxu0 %vm90_vm1, %v1349_v23 }
 0xc23   :  { %v772_v16 = vpop.permute.xlu0 %771 }
 0xc24   :  { %v774_v17 = vmul.f32 %v1586_v15, %v772_v16 }
 0xc26   :  { %776 = vrot.lane.b32.xlu1 %v774_v17, %s1617_s3 }
 0xc87   :  { %v1058_v61 = vpop.f32.mrf.mxu0 }
 0xc89   :  { %v1503_v62 = vpop.f32.mrf.mxu0 }
 0xc8b   :  { %v1061_v1 = vpop.f32.mrf.mxu0 }
 0xc8d   :  { %v1504_v2 = vpop.f32.mrf.mxu0 }
 0xc8f   :  { %v1213_v31 = vpop.f32.mrf.mxu0 }
 0xc91   :  { %v1517_v32 = vpop.f32.mrf.mxu0 }
 0xc93   :  { %v1216_v33 = vpop.f32.mrf.mxu0 }
 0xc98   :  { %v777_v19 = vpop.permute.xlu1 %776 }
 0xc99   :  { %v779_v20 = vadd.f32 %v777_v19, %v769_v18 }
 0xc9b   :  { %1587 = vtanh.f32 %v779_v20 }
 0xca8   :  { %v1588_v25 = vpop.eup %1587 }
 0xca9   :  { %782 = vrot.lane.b32.xlu0 %v1588_v25, %s1616_s7 }
 0xd1b   :  { %v783_v26 = vpop.permute.xlu0 %782 }
 0xd1c   :  { %v785_v27 = vmul.f32 %v1586_v15, %v783_v26 }
 0xd1e   :  { %v1823_v28 = vpack.c.bf16 %v785_v27, %v785_v27 }
 0xd20   :  { %803 = vrot.lane.b32.xlu1 %v1823_v28, %s1617_s3 }
 0xd92   :  { %v804_v35 = vpop.permute.xlu1 %803 }
 0xd93   :  { %1482 = vmatmul.mubr.msk.bf16.vlgmr.msra.gmra.mxu1 %vm40_vm2, %v804_v35  ;;  %v1518_v35 = vpop.f32.mrf.mxu0 }
 0xd94   :  { %1495 = vmatprep.mubr.msk.bf16.mxu1 %vm1614_vm0, %v1613_v0  ;;  %1492 = vmatpush3.bf16.msra.mxu1 %v1544_v53 }
 0xd95   :  { %1493 = vmatprep.subr.bf16.mxu1 %v1613_v0 }
 0xd98   :  { %1494 = vmatpush3.bf16.msra.mxu1 %v1545_v55 }
 0xd99   :  { %1505 = vmatprep.subr.bf16.mxu1 %v1613_v0 }
 0xe53   :  { %v854_v36 = vpop.f32.mrf.mxu1 }
 0xe54   :  { %v904_v37 = vadd.f32 %v903_v29, %v854_v36 }
 0xe55   :  { %v1483_v38 = vpop.f32.mrf.mxu1 }
 0xe56   :  { %v916_v39 = vadd.f32 %v1683_v9, %v904_v37 }
 0xe57   :  { %v857_v40 = vpop.f32.mrf.mxu1 }
 0xe58   :  { %1589 = vtanh.f32 %v916_v39  ;;  %v1336_v43 = vmul.f32 -1.442695, %v916_v39 }
 0xe59   :  { %v1484_v41 = vpop.f32.mrf.mxu1 }
 0xe5a   :  { %1591 = vpow2.f32 %v1336_v43 }
 0xe65   :  { %v1590_v42 = vpop.eup %1589 }
 0xe66   :  { %926 = vrot.lane.b32.xlu0 %v1590_v42, %s1616_s7 }
 0xe67   :  { %v1592_v44 = vpop.eup %1591 }
 0xe68   :  { %v920_v45 = vadd.f32 1.0, %v1592_v44 }
 0xe6a   :  { %1593 = vrcp.f32 %v920_v45 }
 0xe77   :  { %v1594_v46 = vpop.eup %1593 }
 0xe78   :  { %v924_v49 = vmul.f32 %v1594_v46, %v779_v20 }
 0xed8   :  { %v927_v47 = vpop.permute.xlu0 %926 }
 0xed9   :  { %v929_v48 = vmul.f32 %v1594_v46, %v927_v47 }
 0xedb   :  { %931 = vrot.lane.b32.xlu1 %v929_v48, %s1617_s3 }
 0xf4d   :  { %v932_v50 = vpop.permute.xlu1 %931 }
 0xf4e   :  { %v934_v51 = vadd.f32 %v932_v50, %v924_v49 }
 0xf50   :  { %1595 = vtanh.f32 %v934_v51 }
 0xf5d   :  { %v1596_v56 = vpop.eup %1595 }
 0xf5e   :  { %937 = vrot.lane.b32.xlu0 %v1596_v56, %s1616_s7 }
 0xfd0   :  { %v938_v57 = vpop.permute.xlu0 %937 }
 0xfd1   :  { %v940_v58 = vmul.f32 %v1594_v46, %v938_v57 }
 0xfd3   :  { %v1852_v59 = vpack.c.bf16 %v940_v58, %v940_v58 }
 0xfd5   :  { %958 = vrot.lane.b32.xlu1 %v1852_v59, %s1617_s3 }
0x1047   :  { %v959_v3 = vpop.permute.xlu1 %958 }
0x1048   :  { %1496 = vmatmul.mubr.msk.bf16.vlgmr.msra.gmra.mxu1 %vm40_vm2, %v959_v3 }
0x1049   :  { %1509 = vmatprep.mubr.msk.bf16.mxu1 %vm1614_vm0, %v1613_v0  ;;  %1506 = vmatpush3.bf16.msra.mxu1 %v1547_v22 }
0x104a   :  { %1507 = vmatprep.subr.bf16.mxu1 %v1613_v0 }
0x104d   :  { %1508 = vmatpush3.bf16.msra.mxu1 %v1548_v24 }
0x1108   :  { %v1009_v4 = vpop.f32.mrf.mxu1 }
0x1109   :  { %v1059_v5 = vadd.f32 %v1058_v61, %v1009_v4 }
0x110a   :  { %v1497_v6 = vpop.f32.mrf.mxu1 }
0x110b   :  { %v1071_v7 = vadd.f32 %v1683_v9, %v1059_v5 }
0x110c   :  { %v1012_v8 = vpop.f32.mrf.mxu1 }
0x110d   :  { %1597 = vtanh.f32 %v1071_v7  ;;  %v1346_v12 = vmul.f32 -1.442695, %v1071_v7 }
0x110e   :  { %v1498_v10 = vpop.f32.mrf.mxu1 }
0x110f   :  { %1599 = vpow2.f32 %v1346_v12 }
0x111a   :  { %v1598_v11 = vpop.eup %1597 }
0x111b   :  { %1081 = vrot.lane.b32.xlu0 %v1598_v11, %s1616_s7 }
0x111c   :  { %v1600_v13 = vpop.eup %1599 }
0x111d   :  { %v1075_v14 = vadd.f32 1.0, %v1600_v13 }
0x111f   :  { %1601 = vrcp.f32 %v1075_v14 }
0x112c   :  { %v1602_v15 = vpop.eup %1601 }
0x112d   :  { %v1079_v18 = vmul.f32 %v1602_v15, %v934_v51 }
0x118d   :  { %v1082_v16 = vpop.permute.xlu0 %1081 }
0x118e   :  { %v1084_v17 = vmul.f32 %v1602_v15, %v1082_v16 }
0x1190   :  { %1086 = vrot.lane.b32.xlu1 %v1084_v17, %s1617_s3 }
0x1202   :  { %v1087_v19 = vpop.permute.xlu1 %1086 }
0x1203   :  { %v1089_v20 = vadd.f32 %v1087_v19, %v1079_v18 }
0x1205   :  { %1603 = vtanh.f32 %v1089_v20 }
0x1212   :  { %v1604_v25 = vpop.eup %1603 }
0x1213   :  { %1092 = vrot.lane.b32.xlu0 %v1604_v25, %s1616_s7 }
0x1285   :  { %v1093_v26 = vpop.permute.xlu0 %1092 }
0x1286   :  { %v1095_v27 = vmul.f32 %v1602_v15, %v1093_v26 }
0x1288   :  { %v1096_v29 = vpack.c.bf16 %v1095_v27, %v1095_v27 }
0x128a   :  { %1113 = vrot.lane.b32.xlu1 %v1096_v29, %s1617_s3 }
0x12fc   :  { %v1114_v36 = vpop.permute.xlu1 %1113 }
0x12fd   :  { %1510 = vmatmul.mubr.msk.bf16.vlgmr.msra.gmra.mxu1 %vm40_vm2, %v1114_v36 }
0x13bd   :  { %v1164_v37 = vpop.f32.mrf.mxu1 }
0x13be   :  { %v1214_v0 = vadd.f32 %v1213_v31, %v1164_v37 }
0x13bf   :  { %v1511_v38 = vpop.f32.mrf.mxu1 }
0x13c0   :  { %v1226_v39 = vadd.f32 %v1683_v9, %v1214_v0 }
0x13c1   :  { %v1167_v40 = vpop.f32.mrf.mxu1 }
0x13c2   :  { %1605 = vtanh.f32 %v1226_v39  ;;  %v1356_v43 = vmul.f32 -1.442695, %v1226_v39 }
0x13c3   :  { %v1512_v41 = vpop.f32.mrf.mxu1 }
0x13c4   :  { %1607 = vpow2.f32 %v1356_v43 }
0x13cf   :  { %v1606_v42 = vpop.eup %1605 }
0x13d0   :  { %1236 = vrot.lane.b32.xlu0 %v1606_v42, %s1616_s7 }
0x13d1   :  { %v1608_v44 = vpop.eup %1607 }
0x13d2   :  { %v1230_v45 = vadd.f32 1.0, %v1608_v44 }
0x13d4   :  { %1609 = vrcp.f32 %v1230_v45 }
0x13e1   :  { %v1610_v46 = vpop.eup %1609 }
0x13e2   :  { %v1234_v9 = vmul.f32 %v1610_v46, %v1089_v20 }
0x1442   :  { %v1237_v47 = vpop.permute.xlu0 %1236 }
0x1443   :  { %v1239_v48 = vmul.f32 %v1610_v46, %v1237_v47 }
0x1445   :  { %1241 = vrot.lane.b32.xlu1 %v1239_v48, %s1617_s3 }
0x1449   :  { %170 = vrot.lane.b32.xlu1 %v1707_v34, %s1617_s3 }
0x144d   :  { %480 = vrot.lane.b32.xlu1 %v1765_v30, %s1617_s3 }
0x1451   :  { %790 = vrot.lane.b32.xlu1 %v1823_v28, %s1617_s3 }
0x1455   :  { %1100 = vrot.lane.b32.xlu1 %v1096_v29, %s1617_s3 }
0x14b7   :  { %v1242_v49 = vpop.permute.xlu1 %1241 }
0x14b8   :  { %v1244_v50 = vadd.f32 %v1242_v49, %v1234_v9 }
0x14ba   :  { %1611 = vtanh.f32 %v1244_v50 }
0x14bb   :  { %v171_v51 = vpop.permute.xlu1 %170 }
0x14bc   :  { %174 = vst.msk [vmem:[%s1942_s4] sm:$0xf] %vm173_vm3, %v171_v51 }
0x14bf   :  { %v481_v34 = vpop.permute.xlu1 %480 }
0x14c0   :  { %1308 = vst.msk [vmem:[%s1942_s4 + $0x8] sm:$0xf] %vm173_vm3, %v481_v34 }
0x14c3   :  { %v791_v30 = vpop.permute.xlu1 %790 }
0x14c4   :  { %1328 = vst.msk [vmem:[%s1942_s4 + $0x10] sm:$0xf] %vm173_vm3, %v791_v30 }
0x14c7   :  { %v1612_v28 = vpop.eup %1611  ;;  %v1101_v52 = vpop.permute.xlu1 %1100 }
0x14c8   :  { %1348 = vst.msk [vmem:[%s1942_s4 + $0x18] sm:$0xf] %vm173_vm3, %v1101_v52  ;;  %1247 = vrot.lane.b32.xlu0 %v1612_v28, %s1616_s7 }
0x14cc   :  { %325 = vrot.lane.b32.xlu0 %v1736_v63, %s1617_s3 }
0x14d0   :  { %635 = vrot.lane.b32.xlu0 %v1794_v60, %s1617_s3 }
0x14d4   :  { %945 = vrot.lane.b32.xlu0 %v1852_v59, %s1617_s3 }
0x153a   :  { %v1248_v53 = vpop.permute.xlu0 %1247 }
0x153b   :  { %v1250_v54 = vmul.f32 %v1610_v46, %v1248_v53 }
0x153d   :  { %v1366_v55 = vpack.c.bf16 %v1250_v54, %v1250_v54  ;;  %1261 = vrot.lane.b32.xlu1 %v1250_v54, %s1617_s3 }
0x153e   :  { %v326_v56 = vpop.permute.xlu0 %325 }
0x153f   :  { %1298 = vst.msk [vmem:[%s1942_s4 + $0x4] sm:$0xf] %vm173_vm3, %v326_v56  ;;  %1255 = vrot.lane.b32.xlu0 %v1366_v55, %s1617_s3 }
0x1542   :  { %v636_v63 = vpop.permute.xlu0 %635 }
0x1543   :  { %1318 = vst.msk [vmem:[%s1942_s4 + $0xc] sm:$0xf] %vm173_vm3, %v636_v63  ;;  %1266 = vrot.lane.b32.xlu0 %v1244_v50, %s1618_s26 }
0x1546   :  { %v946_v60 = vpop.permute.xlu0 %945 }
0x1547   :  { %1338 = vst.msk [vmem:[%s1942_s4 + $0x14] sm:$0xf] %vm173_vm3, %v946_v60 }
0x15af   :  { %v1262_v57 = vpop.permute.xlu1 %1261 }
0x15b0   :  { %1264 = vst.msk [vmem:[%s1943_s5] sm:$0xff] %vm40_vm2, %v1262_v57 }
0x15b1   :  { %v1256_v58 = vpop.permute.xlu0 %1255 }
0x15b2   :  { %1358 = vst.msk [vmem:[%s1942_s4 + $0x1c] sm:$0xf] %vm173_vm3, %v1256_v58 }
0x15b5   :  { %v1267_v59 = vpop.permute.xlu0 %1266 }
0x15b6   :  { %1269 = vst.msk [vmem:[%s1944_s6] sm:$0xff] %vm40_vm2, %v1267_v59 }

// kernel: _forward.3
= control target key start
LH: loop header
LB: loop body
LE: loop exit
PB: predicated region body
PF: predicated region fallthrough
CT: control target
= control target key end

     0   :  { %s2448_s0 = inlined_call_operand.vmem [shape: s32[8], index: 0, kind: input, shape index: {}]   ;;  %s2449_s1 = inlined_call_operand.vmem [shape: s32[8,8,1], index: 1, kind: input, shape index: {}]   ;;  %s2450_s2 = inlined_call_operand.vmem [shape: f32[8,32], index: 2, kind: input, shape index: {}]   ;;  %s2451_s3 = inlined_call_operand.vmem [shape: f32[8,32], index: 3, kind: input, shape index: {}]   ;;  %s2452_s4 = inlined_call_operand.vmem [shape: bf16[8,8,32], index: 4, kind: input, shape index: {}]   ;;  %s2453_s5 = inlined_call_operand.vmem [shape: bf16[16,16], index: 5, kind: input, shape index: {}]   ;;  %s2454_s6 = inlined_call_operand.vmem [shape: bf16[80,128], index: 6, kind: input, shape index: {}]   ;;  %s2455_s7 = inlined_call_operand.vmem [shape: f32[1,128], index: 7, kind: input, shape index: {}]   ;;  %s2456_s8 = inlined_call_operand.vmem [shape: bf16[64,16], index: 8, kind: input, shape index: {}]   ;;  %s2457_s9 = inlined_call_operand.vmem [shape: f32[1,16], index: 9, kind: input, shape index: {}]   ;;  %s2458_s10 = inlined_call_operand.hbm [shape: f32[8,8,16], index: 10, kind: output, shape index: {}]  }
   0x1   :  { %s15_s15 = sshll.u32 %s2448_s0, 4  ;;  %s16_s15 = int_to_ptr.vmem [resolvable:$true] %s15_s15 }
   0x2   :  { %s2031_s16 = scalar_lea.vmem %s16_s15, 16  ;;  %p2036_p1 = scmp.lt.s32.totalorder %s16_s15, %s16_s15 }
   0x3   :  { %p2032_p0 = scmp.ne.s32.totalorder %s16_s15, %s2031_s16  ;;  %p2037_p2 = scmp.lt.s32.totalorder %s2031_s16, %s2031_s16 }
   0x5   :  { %p2038_p3 = por %p2037_p2, %p2036_p1 }
   0x7   :  { %p2039_p4 = pnand %p2038_p3, %p2032_p0 }
   0x9   :  { %2042 = shalt.err (!%p2039_p4)  }
   0xa   :  { %s2081_s17 = smov [#allocation6]  }
   0xb   :  { %18 = dma.vmem_to_smem %s16_s15, 16, %s2081_s17, [#allocation5] }
   0xc   :  { %2071 = dma.done.wait [#allocation5], 16 }
   0xd   :  { %2072 = vsyncadd [#allocation5], 4294967280 }
   0xe   :  { %20 = sfence }
   0xf   :  { %21 = vsyncpa [#allocation8], 0  ;;  %s2157_s18 = smov 0  }
  0x10 LB: > { %s2163_s0 = sadd.s32 4294967295, %s2079_s18   ;;  %p1715_p5 = scmp.ge.s32.totalorder %s2079_s18, 1  ;;  %s2079_s18 = sphi %s2157_s18, %s27_s18  }
  0x11   : > { %p280_p6 = scmp.lt.s32.totalorder %s2079_s18, 9 }
  0x13   : > { %p281_p7 = pnand %p1715_p5, %p280_p6 }
  0x14   : > { %p1716_p8 = scmp.ne.s32.totalorder (!%p281_p7), %s2163_s0, 0 }
  0x15   : > { %284 = sbr.rel (%p281_p7) target bundleno = 2900 (0xb54), region = 56 }
  0x1a   : > { %310 = sbr.rel (%p1716_p8) target bundleno = 360 (0x168), region = 60 }
  0x1f   : > { %v316_v0 = vld [vmem:[%s2449_s1] sm:$0xff]  ;;  %vm312_vm0 = vcmask 261120   ;;  %v2082_v3 = vmov 0   ;;  %v2083_v4 = vmov 0.0   ;;  %vm2084_vm1 = vmmov 0  }
  0x20   : > { %v311_v1 = vld [vmem:[%s2450_s2] sm:$0xff]  ;;  %1977 = vset.pattern.permute.xlu0 %v2082_v3  ;;  %1811 = vmatprep.subr.bf16.mxu0 %v2083_v4  ;;  %vm334_vm2 = vcmask 130048   ;;  %v317_v6 = vlaneseq  ;;  %vm379_vm4 = vcmask 125952  }
  0x21   : > { %v314_v2 = vld [vmem:[%s2451_s3] sm:$0xff]  ;;  %313 = vst.msk [vmem:[#allocation2] sm:$0xff] %vm312_vm0, %v311_v1  ;;  %320 = vperm.xlu0 %1977, %v316_v0   ;;  %1813 = vmatprep.mubr.msk.bf16.mxu0 %vm2084_vm1, %v2083_v4 }
  0x22   : > { %315 = vst.msk [vmem:[#allocation3] sm:$0xff] %vm312_vm0, %v314_v2  ;;  %v1978_v5 = vld [vmem:[%s2453_s5] sm:$0xff]   ;;  %v318_v7 = vand.u32 127, %v317_v6 }
  0x23   : > { %1812 = vmatpush3.bf16.msra.mxu0 %v1978_v5  ;;  %381 = vst.msk [vmem:[#allocation7] sm:$0xff] %vm334_vm2, %v2083_v4 }
  0x9c   : > { %v321_v8 = vpop.permute.xlu0 %320 }
  0x9d   : > { %vm322_vm3 = vcmp.eq.s32.totalorder %v318_v7, %v321_v8 }
  0x9e   : > { %v1717_v9 = vsel %vm322_vm3, 1.0, %v2083_v4 }
  0x9f   : > { %v325_v10 = vpack.c.bf16 %v1717_v9, %v1717_v9 }
  0xa1   : > { %1814 = vmatmul.mubr.msk.bf16.vlgmr.msra.gmra.mxu0 %vm334_vm2, %v325_v10 }
 0x161   : > { %v372_v11 = vpop.f32.mrf.mxu0 }
 0x162   : > { %v378_v12 = vpack.c.bf16 %v372_v11, %v372_v11 }
 0x163   : > { %v1815_v13 = vpop.f32.mrf.mxu0 }
 0x164   : > { %380 = vst.msk [vmem:[#allocation4] sm:$0xf] %vm379_vm4, %v378_v12 }
 0x165   : > { %v375_v14 = vpop.f32.mrf.mxu0 }
 0x167   : > { %v1816_v15 = vpop.f32.mrf.mxu0 }
 0x168 PF: > { %p1720_p9 = scmp.le.s32.totalorder %s2163_s0, 0 }
 0x169   : > { %s2088_s26 = smov (!%p1720_p9), 48   ;;  %s2089_s15 = smov (!%p1720_p9), 16  }
 0x16a   : > { %385 = sbr.rel (%p1720_p9) target bundleno = 2884 (0xb44), region = 64  ;;  %s2090_s19 = smov (!%p1720_p9), 64  }
 0x16b   : > { %s2091_s20 = smov (!%p1720_p9), 32   ;;  %s2092_s29 = smov (!%p1720_p9), 96  }
 0x16c   : > { %s1755_s30 = sshll.u32 (!%p1720_p9), %s2163_s0, 3  ;;  %p1756_p10 = scmp.ge.s32.totalorder (!%p1720_p9), %s2163_s0, 7 }
 0x16d   : > { %s1566_s13 = scalar_lea.vmem (!%p1720_p9), [#allocation7], %s1755_s30 }
 0x16f   : > { %v2184_v16 = vld [vmem:[%s2452_s4] sm:$0xf]  ;;  %vm435_vm5 = vcmask 261120   ;;  %v2085_v17 = vmov 0.0   ;;  %v2193_v19 = vld [vmem:[%s2452_s4 + $0x4] sm:$0xf]  ;;  %v401_v20 = vlaneseq }
 0x170   : > { %1817 = vmatprep.subr.bf16.mxu0 %v2085_v17  ;;  %v440_v18 = vsel %vm435_vm5, %v2184_v16, 0  ;;  %1823 = vmatprep.subr.bf16.mxu1 %v2085_v17  ;;  %v491_v21 = vsel %vm435_vm5, %v2193_v19, 0  ;;  %vm2086_vm6 = vmmov 0   ;;  %v386_v22 = vld [vmem:[#allocation2] sm:$0xff]  ;;  %v2087_v23 = vmov 1966171168  }
 0x171   : > { %1818 = vmatpush3.bf16.xpose.msra.mxu0 %v440_v18  ;;  %1819 = vmatprep.mubr.msk.bf16.mxu0 %vm2086_vm6, %v2085_v17  ;;  %v399_v24 = vunpack.c.l.s4 %v2087_v23  ;;  %v402_v25 = vshrl.u32 %v401_v20, 7  ;;  %v2204_v26 = vpack.c.bf16 %v386_v22, %v386_v22  ;;  %v2212_v33 = vld [vmem:[%s2452_s4 + $0x8] sm:$0xf]  ;;  %v2217_v37 = vld [vmem:[%s2452_s4 + $0xc] sm:$0xf]  ;;  %vm940_vm7 = vcmask 1043456  }
 0x172   : > { %1824 = vmatpush3.bf16.xpose.msra.mxu1 %v491_v21  ;;  %1829 = vmatprep.subr.bf16.mxu0 %v2085_v17  ;;  %v542_v39 = vsel %vm435_vm5, %v2212_v33, 0  ;;  %v593_v43 = vsel %vm435_vm5, %v2217_v37, 0  ;;  %v2235_v47 = vld [vmem:[%s2452_s4 + $0x10] sm:$0xf]  ;;  %v2242_v49 = vld [vmem:[%s2452_s4 + $0x14] sm:$0xf] }
 0x173   : > { %1825 = vmatprep.mubr.msk.bf16.mxu1 %vm2086_vm6, %v2085_v17  ;;  %1835 = vmatprep.subr.bf16.mxu1 %v2085_v17  ;;  %v400_v27 = vunpack.c.0.s8 %v399_v24  ;;  %v2206_v28 = vsub.s32 0, %v402_v25  ;;  %v644_v50 = vsel %vm435_vm5, %v2235_v47, 0  ;;  %v695_v53 = vsel %vm435_vm5, %v2242_v49, 0  ;;  %v2259_v57 = vld [vmem:[%s2452_s4 + $0x18] sm:$0xf]  ;;  %s1604_s14 = sld [smem:[#allocation6 + %s2163_s0]] (!%p1756_p10) }
 0x174   : > { %v2266_v59 = vld [vmem:[%s2452_s4 + $0x1c] sm:$0xf]  ;;  %v746_v60 = vsel %vm435_vm5, %v2259_v57, 0  ;;  %v941_v3 = vsel %vm940_vm7, %v2184_v16, 0  ;;  %v986_v5 = vsel %vm940_vm7, %v2193_v19, 0  ;;  %vm839_vm8 = vcmask 57344  }
 0x175   : > { %v403_v29 = vsub.s32 %v400_v27, %v402_v25  ;;  %v797_v63 = vsel %vm435_vm5, %v2266_v59, 0  ;;  %vm936_vm9 = vcmask 64512   ;;  %vm1324_vm10 = vcmask 1041409  }
 0x176   : > { %vm1327_vm11 = vcmask 1042434   ;;  %vm1330_vm12 = vcmask 1043459   ;;  %vm1333_vm13 = vcmask 1044484   ;;  %vm1336_vm14 = vcmask 1045509  }
 0x177   : > { %v404_v30 = vrot.slane %v2204_v26, %v403_v29  ;;  %vm1339_vm15 = vcmask 1046534   ;;  %vm1342_vm0 = vcmask 1047559   ;;  %vm1349_vm1 = vcmask 130048  }
 0x178   : > { %vm1353_vm2 = vcmask 392192   ;;  %vm1403_vm3 = vcmask 654336   ;;  %vm1522_vm4 = vcmask 523264  }
 0x179   : > { %v405_v31 = vcombine.high %v404_v30, %v404_v30  ;;  %v412_v32 = vrot.slane %v404_v30, %v403_v29  ;;  %p1605_p11 = scmp.gt.s32.totalorder (!%p1756_p10), %s1604_s14, 0 }
 0x17b   : > { %v1721_v34 = vpack.i.b16 %v412_v32, %v412_v32  ;;  %v423_v35 = vunpack.i.h.s16 %v412_v32  ;;  %v419_v36 = vrot.slane %v405_v31, %v403_v29  ;;  %v420_v46 = vcombine.high %v412_v32, %v412_v32 }
 0x17d   : > { %v434_v38 = vrot.slane %v1721_v34, %v2206_v28  ;;  %v482_v40 = vpack.i.b16 %v423_v35, %v423_v35  ;;  %v425_v41 = vunpack.i.h.s16 %v419_v36  ;;  %v1724_v44 = vpack.i.b16 %v419_v36, %v419_v36 }
 0x17e   : > { %v427_v52 = vunpack.i.h.s16 %v420_v46  ;;  %v1727_v54 = vpack.i.b16 %v420_v46, %v420_v46  ;;  %v421_v56 = vcombine.high %v419_v36, %v419_v36 }
 0x17f   : > { %1820 = vmatmul.mubr.msk.bf16.vlgmr.msra.gmra.mxu0 %vm435_vm5, %v434_v38  ;;  %v486_v42 = vrot.slane %v482_v40, %v2206_v28  ;;  %v584_v45 = vpack.i.b16 %v425_v41, %v425_v41  ;;  %v537_v48 = vrot.slane %v1724_v44, %v2206_v28 }
 0x180   : > { %1830 = vmatpush3.bf16.xpose.msra.mxu0 %v542_v39  ;;  %1831 = vmatprep.mubr.msk.bf16.mxu0 %vm2086_vm6, %v2085_v17  ;;  %v686_v55 = vpack.i.b16 %v427_v52, %v427_v52  ;;  %v639_v58 = vrot.slane %v1727_v54, %v2206_v28  ;;  %v429_v62 = vunpack.i.h.s16 %v421_v56  ;;  %v1730_v0 = vpack.i.b16 %v421_v56, %v421_v56 }
 0x181   : > { %1826 = vmatmul.mubr.msk.bf16.vlgmr.msra.gmra.mxu1 %vm435_vm5, %v486_v42  ;;  %1841 = vmatprep.subr.bf16.mxu0 %v2085_v17  ;;  %v588_v51 = vrot.slane %v584_v45, %v2206_v28 }
 0x182   : > { %1836 = vmatpush3.bf16.xpose.msra.mxu1 %v593_v43  ;;  %1837 = vmatprep.mubr.msk.bf16.mxu1 %vm2086_vm6, %v2085_v17  ;;  %v690_v61 = vrot.slane %v686_v55, %v2206_v28  ;;  %v788_v1 = vpack.i.b16 %v429_v62, %v429_v62  ;;  %v741_v2 = vrot.slane %v1730_v0, %v2206_v28 }
 0x183   : > { %1847 = vmatprep.subr.bf16.mxu1 %v2085_v17 }
 0x184   : > { %v792_v4 = vrot.slane %v788_v1, %v2206_v28 }
 0x187   : > { %1832 = vmatmul.mubr.msk.bf16.vlgmr.msra.gmra.mxu0 %vm435_vm5, %v537_v48 }
 0x188   : > { %1842 = vmatpush3.bf16.xpose.msra.mxu0 %v644_v50  ;;  %1843 = vmatprep.mubr.msk.bf16.mxu0 %vm2086_vm6, %v2085_v17 }
 0x189   : > { %1838 = vmatmul.mubr.msk.bf16.vlgmr.msra.gmra.mxu1 %vm435_vm5, %v588_v51  ;;  %1853 = vmatprep.subr.bf16.mxu0 %v2085_v17 }
 0x18a   : > { %1848 = vmatpush3.bf16.xpose.msra.mxu1 %v695_v53  ;;  %1849 = vmatprep.mubr.msk.bf16.mxu1 %vm2086_vm6, %v2085_v17 }
 0x18b   : > { %1859 = vmatprep.subr.bf16.mxu1 %v2085_v17 }
 0x18f   : > { %1844 = vmatmul.mubr.msk.bf16.vlgmr.msra.gmra.mxu0 %vm435_vm5, %v639_v58 }
 0x190   : > { %1854 = vmatpush3.bf16.xpose.msra.mxu0 %v746_v60  ;;  %1855 = vmatprep.mubr.msk.bf16.mxu0 %vm2086_vm6, %v2085_v17 }
 0x191   : > { %1850 = vmatmul.mubr.msk.bf16.vlgmr.msra.gmra.mxu1 %vm435_vm5, %v690_v61  ;;  %1865 = vmatprep.subr.bf16.mxu0 %v2085_v17 }
 0x192   : > { %1860 = vmatpush3.bf16.xpose.msra.mxu1 %v797_v63  ;;  %1861 = vmatprep.mubr.msk.bf16.mxu1 %vm2086_vm6, %v2085_v17 }
 0x193   : > { %1871 = vmatprep.subr.bf16.mxu1 %v2085_v17 }
 0x197   : > { %1856 = vmatmul.mubr.msk.bf16.vlgmr.msra.gmra.mxu0 %vm435_vm5, %v741_v2 }
 0x198   : > { %1866 = vmatpush3.bf16.msra.mxu0 %v941_v3  ;;  %1867 = vmatprep.mubr.msk.bf16.mxu0 %vm2086_vm6, %v2085_v17 }
 0x199   : > { %1862 = vmatmul.mubr.msk.bf16.vlgmr.msra.gmra.mxu1 %vm435_vm5, %v792_v4  ;;  %1877 = vmatprep.subr.bf16.mxu0 %v2085_v17 }
 0x19a   : > { %1872 = vmatpush3.bf16.msra.mxu1 %v986_v5  ;;  %1873 = vmatprep.mubr.msk.bf16.mxu1 %vm2086_vm6, %v2085_v17 }
 0x19b   : > { %1883 = vmatprep.subr.bf16.mxu1 %v2085_v17 }
 0x23f   : > { %v476_v6 = vpop.f32.mrf.mxu0 }
 0x240   : > { %v840_v7 = vsel %vm839_vm8, %v476_v6, -inf }
 0x241   : > { %841 = vmax.xlane.f32.xlu0 %v840_v7  ;;  %v1821_v8 = vpop.f32.mrf.mxu0  ;;  %v527_v9 = vpop.f32.mrf.mxu1 }
 0x242   : > { %v843_v10 = vsel %vm839_vm8, %v527_v9, -inf }
 0x243   : > { %v479_v11 = vpop.f32.mrf.mxu0  ;;  %v1827_v12 = vpop.f32.mrf.mxu1 }
 0x245   : > { %v1822_v13 = vpop.f32.mrf.mxu0  ;;  %844 = vmax.xlane.f32.xlu0 %v843_v10  ;;  %v530_v14 = vpop.f32.mrf.mxu1 }
 0x247   : > { %v1828_v15 = vpop.f32.mrf.mxu1  ;;  %v578_v16 = vpop.f32.mrf.mxu0 }
 0x248   : > { %v846_v18 = vsel %vm839_vm8, %v578_v16, -inf }
 0x249   : > { %847 = vmax.xlane.f32.xlu1 %v846_v18  ;;  %v1833_v19 = vpop.f32.mrf.mxu0  ;;  %v629_v21 = vpop.f32.mrf.mxu1 }
 0x24a   : > { %v849_v22 = vsel %vm839_vm8, %v629_v21, -inf }
 0x24b   : > { %v581_v23 = vpop.f32.mrf.mxu0  ;;  %v1839_v24 = vpop.f32.mrf.mxu1 }
 0x24d   : > { %v1834_v25 = vpop.f32.mrf.mxu0  ;;  %850 = vmax.xlane.f32.xlu1 %v849_v22  ;;  %v632_v27 = vpop.f32.mrf.mxu1 }
 0x24f   : > { %v1840_v28 = vpop.f32.mrf.mxu1  ;;  %v680_v29 = vpop.f32.mrf.mxu0 }
 0x250   : > { %v852_v30 = vsel %vm839_vm8, %v680_v29, -inf }
 0x251   : > { %853 = vmax.xlane.f32.xlu0 %v852_v30  ;;  %v1845_v31 = vpop.f32.mrf.mxu0  ;;  %v731_v32 = vpop.f32.mrf.mxu1 }
 0x252   : > { %v855_v34 = vsel %vm839_vm8, %v731_v32, -inf }
 0x253   : > { %v683_v35 = vpop.f32.mrf.mxu0  ;;  %856 = vmax.xlane.f32.xlu1 %v855_v34  ;;  %v1851_v36 = vpop.f32.mrf.mxu1 }
 0x255   : > { %v1846_v38 = vpop.f32.mrf.mxu0  ;;  %v734_v39 = vpop.f32.mrf.mxu1 }
 0x257   : > { %v1852_v40 = vpop.f32.mrf.mxu1  ;;  %v782_v41 = vpop.f32.mrf.mxu0 }
 0x258   : > { %v858_v42 = vsel %vm839_vm8, %v782_v41, -inf }
 0x259   : > { %859 = vmax.xlane.f32.xlu0 %v858_v42  ;;  %v1857_v43 = vpop.f32.mrf.mxu0  ;;  %v833_v44 = vpop.f32.mrf.mxu1 }
 0x25a   : > { %v861_v45 = vsel %vm839_vm8, %v833_v44, -inf }
 0x25b   : > { %v785_v46 = vpop.f32.mrf.mxu0  ;;  %862 = vmax.xlane.f32.xlu1 %v861_v45  ;;  %v1863_v48 = vpop.f32.mrf.mxu1 }
 0x25d   : > { %v1858_v50 = vpop.f32.mrf.mxu0  ;;  %v836_v51 = vpop.f32.mrf.mxu1 }
 0x25e   : > { %v1076_v51 = vsel %vm940_vm7, %v2217_v37, 0 }
 0x25f   : > { %v1864_v52 = vpop.f32.mrf.mxu1 }
 0x2ca   : > { %v842_v53 = vpop.xlane.xlu0 %841 }
 0x2cb   : > { %v864_v54 = vsub.f32 %v476_v6, %v842_v53 }
 0x2cd   : > { %v872_v55 = vmul.f32 1.442695, %v864_v54 }
 0x2ce   : > { %v845_v56 = vpop.xlane.xlu0 %844 }
 0x2cf   : > { %1988 = vpow2.f32 %v872_v55  ;;  %v865_v58 = vsub.f32 %v527_v9, %v845_v56  ;;  %v1121_v55 = vsel %vm940_vm7, %v2235_v47, 0 }
 0x2d1   : > { %v874_v60 = vmul.f32 1.442695, %v865_v58 }
 0x2d2   : > { %v848_v61 = vpop.xlane.xlu1 %847 }
 0x2d3   : > { %1990 = vpow2.f32 %v874_v60  ;;  %v866_v62 = vsub.f32 %v578_v16, %v848_v61  ;;  %v1166_v61 = vsel %vm940_vm7, %v2242_v49, 0 }
 0x2d5   : > { %v876_v63 = vmul.f32 1.442695, %v866_v62 }
 0x2d6   : > { %v851_v0 = vpop.xlane.xlu1 %850 }
 0x2d7   : > { %1992 = vpow2.f32 %v876_v63  ;;  %v867_v1 = vsub.f32 %v629_v21, %v851_v0 }
 0x2d9   : > { %v878_v2 = vmul.f32 1.442695, %v867_v1  ;;  %v1211_v1 = vsel %vm940_vm7, %v2259_v57, 0 }
 0x2da   : > { %v854_v3 = vpop.xlane.xlu0 %853 }
 0x2db   : > { %1994 = vpow2.f32 %v878_v2  ;;  %v868_v4 = vsub.f32 %v680_v29, %v854_v3  ;;  %v1256_v3 = vsel %vm940_vm7, %v2266_v59, 0 }
 0x2dc   : > { %v1989_v5 = vpop.eup %1988  ;;  %v857_v7 = vpop.xlane.xlu1 %856 }
 0x2dd   : > { %v880_v8 = vmul.f32 1.442695, %v868_v4  ;;  %v869_v6 = vsub.f32 %v731_v32, %v857_v7  ;;  %v888_v10 = vsel %vm839_vm8, %v1989_v5, 0.0 }
 0x2de   : > { %889 = vadd.xlane.f32.xlu0 %v888_v10  ;;  %v1980_v10 = vld [vmem:[%s2454_s6 + $0x18] sm:$0xff]  }
 0x2df   : > { %1996 = vpow2.f32 %v880_v8  ;;  %v882_v9 = vmul.f32 1.442695, %v869_v6  ;;  %v1979_v6 = vld [vmem:[%s2454_s6 + $0x20] sm:$0xff]  }
 0x2e0   : > { %v1991_v11 = vpop.eup %1990 }
 0x2e1   : > { %1998 = vpow2.f32 %v882_v9  ;;  %v891_v12 = vsel %vm839_vm8, %v1991_v11, 0.0  ;;  %v1981_v9 = vld [vmem:[%s2454_s6 + $0x10] sm:$0xff]  }
 0x2e2   : > { %v860_v13 = vpop.xlane.xlu0 %859  ;;  %892 = vadd.xlane.f32.xlu1 %v891_v12 }
 0x2e3   : > { %v870_v14 = vsub.f32 %v782_v41, %v860_v13 }
 0x2e4   : > { %v1993_v15 = vpop.eup %1992  ;;  %v863_v16 = vpop.xlane.xlu1 %862 }
 0x2e5   : > { %v884_v18 = vmul.f32 1.442695, %v870_v14  ;;  %v871_v19 = vsub.f32 %v833_v44, %v863_v16  ;;  %v894_v21 = vsel %vm839_vm8, %v1993_v15, 0.0  ;;  %v1031_v44 = vsel %vm940_vm7, %v2212_v33, 0 }
 0x2e6   : > { %895 = vadd.xlane.f32.xlu0 %v894_v21 }
 0x2e7   : > { %2000 = vpow2.f32 %v884_v18  ;;  %v886_v22 = vmul.f32 1.442695, %v871_v19 }
 0x2e8   : > { %v1995_v23 = vpop.eup %1994 }
 0x2e9   : > { %2002 = vpow2.f32 %v886_v22  ;;  %v897_v24 = vsel %vm839_vm8, %v1995_v23, 0.0 }
 0x2ea   : > { %898 = vadd.xlane.f32.xlu1 %v897_v24 }
 0x2ec   : > { %v1997_v25 = vpop.eup %1996 }
 0x2ed   : > { %v900_v27 = vsel %vm839_vm8, %v1997_v25, 0.0 }
 0x2ee   : > { %v2308_v28 = vpop.eup %1998  ;;  %901 = vadd.xlane.f32.xlu0 %v900_v27 }
 0x2ef   : > { %v903_v29 = vsel %vm839_vm8, %v2308_v28, 0.0 }
 0x2f0   : > { %904 = vadd.xlane.f32.xlu1 %v903_v29 }
 0x2f4   : > { %v2312_v30 = vpop.eup %2000 }
 0x2f5   : > { %v906_v31 = vsel %vm839_vm8, %v2312_v30, 0.0 }
 0x2f6   : > { %v2316_v32 = vpop.eup %2002  ;;  %907 = vadd.xlane.f32.xlu0 %v906_v31 }
 0x2f7   : > { %v909_v34 = vsel %vm839_vm8, %v2316_v32, 0.0 }
 0x2f8   : > { %910 = vadd.xlane.f32.xlu1 %v909_v34 }
 0x309   : > { %1347 = vrot.lane.b32.xlu1 %v2204_v26, %s2088_s26  ;;  %v1983_v26 = vld [vmem:[%s2454_s6] sm:$0xff]  }
 0x367   : > { %v890_v35 = vpop.xlane.xlu0 %889 }
 0x368   : > { %2004 = vrcp.f32 %v890_v35 }
 0x36b   : > { %v893_v36 = vpop.xlane.xlu1 %892 }
 0x36c   : > { %2006 = vrcp.f32 %v893_v36 }
 0x36f   : > { %v896_v38 = vpop.xlane.xlu0 %895 }
 0x370   : > { %2008 = vrcp.f32 %v896_v38 }
 0x373   : > { %v899_v39 = vpop.xlane.xlu1 %898 }
 0x374   : > { %2010 = vrcp.f32 %v899_v39 }
 0x375   : > { %v2005_v40 = vpop.eup %2004 }
 0x376   : > { %v913_v41 = vmul.f32 %v2005_v40, %v1989_v5 }
 0x377   : > { %v902_v42 = vpop.xlane.xlu0 %901 }
 0x378   : > { %2012 = vrcp.f32 %v902_v42  ;;  %v928_v43 = vpack.c.bf16 %v913_v41, %v913_v41 }
 0x379   : > { %v2007_v45 = vpop.eup %2006  ;;  %v905_v46 = vpop.xlane.xlu1 %904 }
 0x37a   : > { %2014 = vrcp.f32 %v905_v46  ;;  %1868 = vmatmul.mubr.msk.bf16.vlgmr.msra.gmra.mxu0 %vm936_vm9, %v928_v43  ;;  %v915_v48 = vmul.f32 %v2007_v45, %v1991_v11  ;;  %v1982_v11 = vld [vmem:[%s2454_s6 + $0x8] sm:$0xff]  }
 0x37b   : > { %1878 = vmatpush3.bf16.msra.mxu0 %v1031_v44  ;;  %1879 = vmatprep.mubr.msk.bf16.mxu0 %vm2086_vm6, %v2085_v17 }
 0x37c   : > { %v929_v50 = vpack.c.bf16 %v915_v48, %v915_v48  ;;  %1889 = vmatprep.subr.bf16.mxu0 %v2085_v17 }
 0x37d   : > { %v2009_v52 = vpop.eup %2008 }
 0x37e   : > { %1874 = vmatmul.mubr.msk.bf16.vlgmr.msra.gmra.mxu1 %vm936_vm9, %v929_v50  ;;  %v917_v33 = vmul.f32 %v2009_v52, %v1993_v15 }
 0x37f   : > { %1884 = vmatpush3.bf16.msra.mxu1 %v1076_v51  ;;  %v908_v53 = vpop.xlane.xlu0 %907  ;;  %1885 = vmatprep.mubr.msk.bf16.mxu1 %vm2086_vm6, %v2085_v17 }
 0x380   : > { %2016 = vrcp.f32 %v908_v53  ;;  %v930_v54 = vpack.c.bf16 %v917_v33, %v917_v33  ;;  %1895 = vmatprep.subr.bf16.mxu1 %v2085_v17 }
 0x381   : > { %v2011_v56 = vpop.eup %2010  ;;  %v911_v37 = vpop.xlane.xlu1 %910 }
 0x382   : > { %2018 = vrcp.f32 %v911_v37  ;;  %1880 = vmatmul.mubr.msk.bf16.vlgmr.msra.gmra.mxu0 %vm936_vm9, %v930_v54  ;;  %v919_v58 = vmul.f32 %v2011_v56, %v1995_v23 }
 0x383   : > { %1890 = vmatpush3.bf16.msra.mxu0 %v1121_v55  ;;  %1891 = vmatprep.mubr.msk.bf16.mxu0 %vm2086_vm6, %v2085_v17 }
 0x384   : > { %v931_v60 = vpack.c.bf16 %v919_v58, %v919_v58  ;;  %1901 = vmatprep.subr.bf16.mxu0 %v2085_v17 }
 0x385   : > { %v2013_v62 = vpop.eup %2012 }
 0x386   : > { %1886 = vmatmul.mubr.msk.bf16.vlgmr.msra.gmra.mxu1 %vm936_vm9, %v931_v60  ;;  %v921_v47 = vmul.f32 %v2013_v62, %v1997_v25 }
 0x387   : > { %v2015_v63 = vpop.eup %2014  ;;  %1896 = vmatpush3.bf16.msra.mxu1 %v1166_v61  ;;  %1897 = vmatprep.mubr.msk.bf16.mxu1 %vm2086_vm6, %v2085_v17 }
 0x388   : > { %v932_v0 = vpack.c.bf16 %v921_v47, %v921_v47  ;;  %1907 = vmatprep.subr.bf16.mxu1 %v2085_v17  ;;  %v923_v2 = vmul.f32 %v2015_v63, %v2308_v28 }
 0x38a   : > { %1892 = vmatmul.mubr.msk.bf16.vlgmr.msra.gmra.mxu0 %vm936_vm9, %v932_v0  ;;  %v933_v49 = vpack.c.bf16 %v923_v2, %v923_v2 }
 0x38b   : > { %1902 = vmatpush3.bf16.msra.mxu0 %v1211_v1  ;;  %1903 = vmatprep.mubr.msk.bf16.mxu0 %vm2086_vm6, %v2085_v17 }
 0x38c   : > { %1913 = vmatprep.subr.bf16.mxu0 %v2085_v17 }
 0x38d   : > { %v2017_v4 = vpop.eup %2016 }
 0x38e   : > { %1898 = vmatmul.mubr.msk.bf16.vlgmr.msra.gmra.mxu1 %vm936_vm9, %v933_v49  ;;  %v925_v57 = vmul.f32 %v2017_v4, %v2312_v30 }
 0x38f   : > { %v2019_v5 = vpop.eup %2018  ;;  %1908 = vmatpush3.bf16.msra.mxu1 %v1256_v3  ;;  %1909 = vmatprep.mubr.msk.bf16.mxu1 %vm2086_vm6, %v2085_v17 }
 0x390   : > { %v934_v7 = vpack.c.bf16 %v925_v57, %v925_v57  ;;  %v927_v8 = vmul.f32 %v2019_v5, %v2316_v32  ;;  %1927 = vmatprep.subr.bf16.mxu1 %v2085_v17 }
 0x392   : > { %1904 = vmatmul.mubr.msk.bf16.vlgmr.msra.gmra.mxu0 %vm936_vm9, %v934_v7  ;;  %v935_v59 = vpack.c.bf16 %v927_v8, %v927_v8 }
 0x393   : > { %1923 = vmatprep.mubr.msk.bf16.mxu0 %vm2086_vm6, %v2085_v17  ;;  %1914 = vmatpush3.bf16.msra.mxu0 %v1979_v6 }
 0x394   : > { %1915 = vmatprep.subr.bf16.mxu0 %v2085_v17 }
 0x396   : > { %1910 = vmatmul.mubr.msk.bf16.vlgmr.msra.gmra.mxu1 %vm936_vm9, %v935_v59 }
 0x397   : > { %1935 = vmatprep.mubr.msk.bf16.mxu1 %vm2086_vm6, %v2085_v17  ;;  %1916 = vmatpush3.bf16.msra.mxu0 %v1980_v10 }
 0x398   : > { %1917 = vmatprep.subr.bf16.mxu0 %v2085_v17 }
 0x39b   : > { %1918 = vmatpush3.bf16.msra.mxu0 %v1981_v9 }
 0x39c   : > { %1919 = vmatprep.subr.bf16.mxu0 %v2085_v17 }
 0x39f   : > { %1920 = vmatpush3.bf16.msra.mxu0 %v1982_v11 }
 0x3a0   : > { %1921 = vmatprep.subr.bf16.mxu0 %v2085_v17 }
 0x3a3   : > { %1922 = vmatpush3.bf16.msra.mxu0 %v1983_v26 }
 0x43a   : > { %v977_v12 = vpop.f32.mrf.mxu0 }
 0x43b   : > { %v1298_v46 = vpack.c.bf16 %v977_v12, %v977_v12 }
 0x43c   : > { %v1869_v13 = vpop.f32.mrf.mxu0 }
 0x43d   : > { %v1315_v58 = vunpack.c.l.b16 %v1298_v46  ;;  %v1306_v13 = vld [vmem:[#allocation4] sm:$0xf] }
 0x43e   : > { %v980_v14 = vpop.f32.mrf.mxu0  ;;  %v1022_v15 = vpop.f32.mrf.mxu1 }
 0x43f   : > { %v1299_v31 = vpack.c.bf16 %v1022_v15, %v1022_v15  ;;  %v1348_v14 = vpop.permute.xlu1 %1347 }
 0x440   : > { %v1870_v16 = vpop.f32.mrf.mxu0  ;;  %v1875_v18 = vpop.f32.mrf.mxu1 }
 0x441   : > { %v1316_v41 = vunpack.c.l.b16 %v1299_v31 }
 0x442   : > { %v1025_v19 = vpop.f32.mrf.mxu1  ;;  %v1067_v21 = vpop.f32.mrf.mxu0 }
 0x443   : > { %v1300_v32 = vpack.c.bf16 %v1067_v21, %v1067_v21  ;;  %v1323_v33 = vrot.slane %v1316_v41, 7  ;;  %v1741_v19 = vld [vmem:[%s2455_s7] ss:$0 sm:$0xff]  ;;  %v1984_v41 = vld [vmem:[%s2456_s8 + $0x18] sm:$0xff]  }
 0x444   : > { %v1876_v22 = vpop.f32.mrf.mxu1  ;;  %v1881_v23 = vpop.f32.mrf.mxu0  ;;  %1928 = vmatpush3.bf16.msra.mxu1 %v1984_v41 }
 0x445   : > { %v1317_v43 = vunpack.c.l.b16 %v1300_v32  ;;  %v1325_v0 = vsel %vm1324_vm10, %v1323_v33, %v1315_v58  ;;  %1929 = vmatprep.subr.bf16.mxu1 %v2085_v17 }
 0x446   : > { %v1070_v24 = vpop.f32.mrf.mxu0  ;;  %v1112_v25 = vpop.f32.mrf.mxu1 }
 0x447   : > { %v1301_v36 = vpack.c.bf16 %v1112_v25, %v1112_v25  ;;  %v1326_v55 = vrot.slane %v1317_v43, 6 }
 0x448   : > { %v1882_v27 = vpop.f32.mrf.mxu0  ;;  %v1887_v28 = vpop.f32.mrf.mxu1 }
 0x449   : > { %v1318_v48 = vunpack.c.l.b16 %v1301_v36  ;;  %v1328_v49 = vsel %vm1327_vm11, %v1326_v55, %v1325_v0  ;;  %v387_v28 = vld [vmem:[#allocation3] sm:$0xff] }
 0x44a   : > { %v1115_v29 = vpop.f32.mrf.mxu1  ;;  %v1157_v30 = vpop.f32.mrf.mxu0 }
 0x44b   : > { %v1302_v38 = vpack.c.bf16 %v1157_v30, %v1157_v30  ;;  %v1329_v60 = vrot.slane %v1318_v48, 5 }
 0x44c   : > { %v1888_v34 = vpop.f32.mrf.mxu1  ;;  %v1893_v35 = vpop.f32.mrf.mxu0 }
 0x44d   : > { %v1319_v50 = vunpack.c.l.b16 %v1302_v38  ;;  %v1331_v5 = vsel %vm1330_vm12, %v1329_v60, %v1328_v49 }
 0x44e   : > { %v1160_v39 = vpop.f32.mrf.mxu0  ;;  %v1202_v40 = vpop.f32.mrf.mxu1 }
 0x44f   : > { %v1303_v42 = vpack.c.bf16 %v1202_v40, %v1202_v40  ;;  %v1332_v62 = vrot.slane %v1319_v50, 4 }
 0x450   : > { %v1894_v44 = vpop.f32.mrf.mxu0  ;;  %v1899_v45 = vpop.f32.mrf.mxu1 }
 0x451   : > { %v1320_v53 = vunpack.c.l.b16 %v1303_v42  ;;  %v1334_v8 = vsel %vm1333_vm13, %v1332_v62, %v1331_v5  ;;  %v1985_v42 = vld [vmem:[%s2456_s8 + $0x10] sm:$0xff]   ;;  %v1986_v44 = vld [vmem:[%s2456_s8 + $0x8] sm:$0xff]   ;;  %v1987_v45 = vld [vmem:[%s2456_s8] sm:$0xff]  }
 0x452   : > { %v1205_v51 = vpop.f32.mrf.mxu1  ;;  %v1247_v52 = vpop.f32.mrf.mxu0  ;;  %1930 = vmatpush3.bf16.msra.mxu1 %v1985_v42 }
 0x453   : > { %v1304_v54 = vpack.c.bf16 %v1247_v52, %v1247_v52  ;;  %v1335_v1 = vrot.slane %v1320_v53, 3  ;;  %1931 = vmatprep.subr.bf16.mxu1 %v2085_v17 }
 0x454   : > { %v1900_v56 = vpop.f32.mrf.mxu1  ;;  %v1905_v37 = vpop.f32.mrf.mxu0 }
 0x455   : > { %v1321_v61 = vunpack.c.l.b16 %v1304_v54  ;;  %v1337_v6 = vsel %vm1336_vm14, %v1335_v1, %v1334_v8  ;;  %v1749_v54 = vld [vmem:[%s2457_s9] ss:$0 sm:$0xff] }
 0x456   : > { %v1250_v47 = vpop.f32.mrf.mxu0  ;;  %v1292_v63 = vpop.f32.mrf.mxu1  ;;  %1932 = vmatpush3.bf16.msra.mxu1 %v1986_v44 }
 0x457   : > { %v1305_v2 = vpack.c.bf16 %v1292_v63, %v1292_v63  ;;  %v1338_v3 = vrot.slane %v1321_v61, 2  ;;  %1933 = vmatprep.subr.bf16.mxu1 %v2085_v17 }
 0x458   : > { %v1906_v4 = vpop.f32.mrf.mxu0  ;;  %v1911_v57 = vpop.f32.mrf.mxu1 }
 0x459   : > { %v1322_v7 = vunpack.c.l.b16 %v1305_v2  ;;  %v1340_v9 = vsel %vm1339_vm15, %v1338_v3, %v1337_v6 }
 0x45a   : > { %v1295_v59 = vpop.f32.mrf.mxu1  ;;  %1934 = vmatpush3.bf16.msra.mxu1 %v1987_v45 }
 0x45b   : > { %v1341_v10 = vrot.slane %v1322_v7, 1 }
 0x45c   : > { %v1912_v11 = vpop.f32.mrf.mxu1 }
 0x45d   : > { %v1343_v26 = vsel %vm1342_vm0, %v1341_v10, %v1340_v9 }
 0x45e   : > { %v1344_v12 = vpack.c.b16 %v1343_v26, %v1343_v26 }
 0x460   : > { %1345 = vrot.lane.b32.xlu0 %v1344_v12, %s2089_s15 }
 0x4d2   : > { %v1346_v15 = vpop.permute.xlu0 %1345 }
 0x4d3   : > { %v1352_v16 = vsel %vm1349_vm1, %v1306_v13, %v1346_v15 }
 0x4d4   : > { %v1355_v18 = vsel %vm1353_vm2, %v1352_v16, %v1348_v14 }
 0x4d5   : > { %1924 = vmatmul.mubr.msk.bf16.vlgmr.msra.gmra.mxu0 %vm1403_vm3, %v1355_v18 }
 0x595   : > { %v1440_v21 = vpop.f32.mrf.mxu0 }
 0x596   : > { %v1441_v22 = vadd.f32 %v1741_v19, %v1440_v21 }
 0x597   : > { %v1925_v23 = vpop.f32.mrf.mxu0 }
 0x598   : > { %2020 = vtanh.f32 %v1441_v22  ;;  %v1748_v29 = vmul.f32 -1.442695, %v1441_v22 }
 0x599   : > { %v1443_v24 = vpop.f32.mrf.mxu0 }
 0x59a   : > { %2022 = vpow2.f32 %v1748_v29 }
 0x59b   : > { %v1926_v25 = vpop.f32.mrf.mxu0 }
 0x5a5   : > { %v2021_v27 = vpop.eup %2020 }
 0x5a6   : > { %1459 = vrot.lane.b32.xlu1 %v2021_v27, %s2090_s19 }
 0x5a7   : > { %v2023_v30 = vpop.eup %2022 }
 0x5a8   : > { %v1449_v31 = vadd.f32 1.0, %v2023_v30 }
 0x5aa   : > { %1454 = vrot.lane.b32.xlu1 %v387_v28, %s2091_s20  ;;  %2024 = vrcp.f32 %v1449_v31 }
 0x5b7   : > { %v2025_v32 = vpop.eup %2024 }
 0x618   : > { %v1460_v34 = vpop.permute.xlu1 %1459 }
 0x619   : > { %v1462_v35 = vmul.f32 %v2025_v32, %v1460_v34 }
 0x61b   : > { %1464 = vrot.lane.b32.xlu0 %v1462_v35, %s2091_s20 }
 0x61c   : > { %v1455_v36 = vpop.permute.xlu1 %1454 }
 0x61d   : > { %v1457_v38 = vmul.f32 %v2025_v32, %v1455_v36 }
 0x68d   : > { %v1465_v39 = vpop.permute.xlu0 %1464 }
 0x68e   : > { %v1467_v40 = vadd.f32 %v1465_v39, %v1457_v38 }
 0x690   : > { %2026 = vtanh.f32 %v1467_v40 }
 0x69d   : > { %v2027_v43 = vpop.eup %2026 }
 0x69e   : > { %1470 = vrot.lane.b32.xlu1 %v2027_v43, %s2090_s19  ;;  %s1606_s19 = scalar_lea.vmem (!%p1756_p10), %s2449_s1, %s1755_s30 }
 0x6a2   : > { %1478 = vrot.lane.b32.xlu1 %v1344_v12, %s2091_s20 }
 0x6a6   : > { %1574 = vrot.lane.b32.xlu1 %v1467_v40, %s2092_s29 }
 0x710   : > { %v1471_v46 = vpop.permute.xlu1 %1470 }
 0x711   : > { %v1473_v48 = vmul.f32 %v2025_v32, %v1471_v46 }
 0x713   : > { %v1474_v50 = vpack.c.bf16 %v1473_v48, %v1473_v48 }
 0x714   : > { %v1479_v51 = vpop.permute.xlu1 %1478 }
 0x715   : > { %1476 = vrot.lane.b32.xlu0 %v1474_v50, %s2091_s20 }
 0x718   : > { %v1575_v52 = vpop.permute.xlu1 %1574 }
 0x719   : > { %1577 = vst.msk [vmem:[#allocation3] sm:$0xff] %vm435_vm5, %v1575_v52  ;;  %1569 = vrot.lane.b32.xlu0 %v1473_v48, %s2091_s20 }
 0x787   : > { %v1477_v33 = vpop.permute.xlu0 %1476 }
 0x788   : > { %v1482_v17 = vsel %vm435_vm5, %v1477_v33, %v1479_v51 }
 0x789   : > { %1936 = vmatmul.mubr.msk.bf16.vlgmr.msra.gmra.mxu1 %vm1522_vm4, %v1482_v17 }
 0x78b   : > { %v1570_v53 = vpop.permute.xlu0 %1569 }
 0x78c   : > { %1572 = vst.msk [vmem:[#allocation2] sm:$0xff] %vm435_vm5, %v1570_v53 }
 0x849   : > { %v1559_v55 = vpop.f32.mrf.mxu1 }
 0x84a   : > { %v1560_v56 = vadd.f32 %v1749_v54, %v1559_v55 }
 0x84b   : > { %v1937_v37 = vpop.f32.mrf.mxu1  ;;  %1581 = sbr.rel (%p1756_p10) target bundleno = 2884 (0xb44), region = 68 }
 0x84c   : > { %1567 = vst.msk [vmem:[%s1566_s13] sm:$0xff] %vm1349_vm1, %v1560_v56 }
 0x84d   : > { %v1562_v58 = vpop.f32.mrf.mxu1 }
 0x84f   : > { %v1938_v60 = vpop.f32.mrf.mxu1 }
 0x850   : > { %v1584_v61 = vsel %vm1349_vm1, %v1560_v56, -inf  ;;  %v1583_v62 = vand.u32 127, %v401_v20  ;;  %v2093_v5 = vmov 0   ;;  %v2094_v20 = vmov 0.0   ;;  %s1608_s15 = scalar_select %p1605_p11, 1, 0 }
 0x851   : > { %1585 = vmax.xlane.f32.xlu0 %v1584_v61  ;;  %2028 = vset.pattern.permute.xlu1 %v2093_v5  ;;  %v2030_v9 = vld [vmem:[%s2453_s5] sm:$0xff]   ;;  %vm2095_vm8 = vmmov 0   ;;  %vm1671_vm10 = vcmask 125952  }
 0x852   : > { %2029 = vset.pattern.permute.xlu0 %v2093_v5  ;;  %1939 = vmatprep.subr.bf16.mxu0 %v2094_v20  ;;  %v1609_v8 = vstv %s1608_s15  ;;  %v1607_v11 = vld [vmem:[%s1606_s19] sm:$0xff] }
 0x853   : > { %vm1610_vm7 = vcmp.eq.s32.totalorder %v1609_v8, 1  ;;  %1940 = vmatpush3.bf16.msra.mxu0 %v2030_v9  ;;  %1941 = vmatprep.mubr.msk.bf16.mxu0 %vm2095_vm8, %v2094_v20 }
 0x8da   : > { %v1586_v47 = vpop.xlane.xlu0 %1585 }
 0x8db   : > { %vm1587_vm5 = vcmp.ge.f32.partialorder %v1560_v56, %v1586_v47 }
 0x8dc   : > { %v1588_v63 = vsel %vm1587_vm5, %v1583_v62, 16 }
 0x8dd   : > { %v1589_v0 = vsel %vm1349_vm1, %v1588_v63, 2147483647 }
 0x8de   : > { %v1591_v1 = vshra.s32 %v1589_v0, 16  ;;  %v1590_v49 = vand.u32 65535, %v1589_v0 }
 0x8e0   : > { %v1593_v2 = vcvt.s32.f32 %v1591_v1  ;;  %v1592_v4 = vcvt.s32.f32 %v1590_v49 }
 0x8e2   : > { %1594 = vmin.xlane.f32.xlu0 %v1593_v2 }
 0x96b   : > { %v1595_v3 = vpop.xlane.xlu0 %1594 }
 0x96c   : > { %vm1596_vm6 = vcmp.eq.f32.partialorder %v1593_v2, %v1595_v3  ;;  %v1601_v7 = vcvt.f32.s32 %v1595_v3 }
 0x96d   : > { %v1597_v57 = vsel %vm1596_vm6, %v1592_v4, inf }
 0x96e   : > { %1598 = vmin.xlane.f32.xlu1 %v1597_v57  ;;  %v1602_v6 = vshll.u32 %v1601_v7, 16 }
 0x9f7   : > { %v1599_v59 = vpop.xlane.xlu1 %1598 }
 0x9f8   : > { %v1600_v10 = vcvt.f32.s32 %v1599_v59 }
 0x9fa   : > { %v1603_v26 = vadd.s32 %v1602_v6, %v1600_v10 }
 0x9fc   : > { %v1611_v12 = vsel %vm1610_vm7, %v1607_v11, %v1603_v26 }
 0x9fd   : > { %1613 = vperm.xlu1 %2028, %v1611_v12  }
 0xa78   : > { %v1614_v13 = vpop.permute.xlu1 %1613 }
 0xa79   : > { %vm1615_vm9 = vcmp.eq.s32.totalorder %v1583_v62, %v1614_v13 }
 0xa7a   : > { %v1757_v14 = vsel %vm1615_vm9, 1.0, %v2094_v20 }
 0xa7b   : > { %v1618_v15 = vpack.c.bf16 %v1757_v14, %v1757_v14 }
 0xa7d   : > { %1942 = vmatmul.mubr.msk.bf16.vlgmr.msra.gmra.mxu0 %vm1349_vm1, %v1618_v15 }
 0xb3d   : > { %v1664_v16 = vpop.f32.mrf.mxu0 }
 0xb3e   : > { %v1670_v18 = vpack.c.bf16 %v1664_v16, %v1664_v16 }
 0xb3f   : > { %v1943_v19 = vpop.f32.mrf.mxu0 }
 0xb40   : > { %1672 = vst.msk [vmem:[#allocation4] sm:$0xf] %vm1671_vm10, %v1670_v18 }
 0xb41   : > { %v1667_v21 = vpop.f32.mrf.mxu0 }
 0xb43   : > { %v1944_v22 = vpop.f32.mrf.mxu0 }
 0xb44 PF: > { %p1949_p12 = scmp.eq.s32.totalorder %s2163_s0, 7  ;;  %s2096_s22 = smov [#allocation7]  }
 0xb45   : > { %s1679_s23 = sshll.u32 %s2096_s22, 4  ;;  %s1680_s23 = int_to_ptr.vmem [resolvable:$true] %s1679_s23 }
 0xb46   : > { %s2043_s24 = scalar_lea.vmem %s1680_s23, 1024  ;;  %p2050_p2 = scmp.lt.s32.totalorder %s1680_s23, %s1680_s23 }
 0xb47   : > { %p2044_p13 = scmp.ne.s32.totalorder %s1680_s23, %s2043_s24  ;;  %p2051_p3 = scmp.lt.s32.totalorder %s2043_s24, %s2043_s24 }
 0xb49   : > { %p2045_p0 = pnand %p2044_p13, %p1949_p12  ;;  %p2052_p4 = por %p2051_p3, %p2050_p2 }
 0xb4b   : > { %p2046_p1 = pneg %p2045_p0 }
 0xb4d   : > { %p2053_p5 = pnand %p2052_p4, %p2046_p1 }
 0xb4f   : > { %2056 = shalt.err (!%p2053_p5)
}
 0xb50   : > { %s2097_s25 = smov 128   ;;  %s2098_s26 = smov 8  }
 0xb51   : > { %1946 = dma.vmem_to_hbm [thread:$0]  (%p1949_p12), %s1680_s23, 1024, %s2458_s10, [#allocation8], %s2097_s25, %s2097_s25, %s2098_s26  }
 0xb52   : > { %2074 = dma.done.wait (%p1949_p12), [#allocation8], 1024  }
 0xb53   : > { %2076 = vsyncadd (%p1949_p12), [#allocation8], 4294966272 }
 0xb54 PF: > { %s27_s18 = sadd.s32 1, %s2079_s18  }
 0xb55   : > { %p24_p6 = scmp.ge.s32.totalorder %s27_s18, 10  }
 0xb57   :  { %26 = sbr.rel (!%p24_p6) target bundleno = 16 (0x10), region = 94 }
 0xb5c   :  { %1695 = vsyncpa [#allocation8], 1 }
 0xb5d   :  { %1697 = vsyncpa [#allocation8 + $0x1], 1 }

</bundles_post_ra>
